<compile_context>
chip_gen: v6e
topology: v6e:2x2x1
jax: 0.10.0
libtpu: 0.0.40
codegen_flags: <defaults>
</compile_context>

<pallas_src>
import jax
import jax.numpy as jnp
import numpy as np
from jax import lax
from jax.experimental import pallas as pl
from jax.experimental.pallas import tpu as pltpu


def _tap_masks(H, W):
    """(9, H*W) float32 0/1 masks.  mask[t, h*W + w] == 1 iff tap t = dy*3+dx
    of a 3x3/padding-1 conv reads an in-bounds pixel at (h+dy-1, w+dx-1)."""
    hh, ww = np.meshgrid(np.arange(H), np.arange(W), indexing="ij")
    hh = hh.reshape(-1)
    ww = ww.reshape(-1)
    m = np.zeros((9, H * W), np.float32)
    for t in range(9):
        dy, dx = t // 3, t % 3
        ok = ((hh + dy - 1 >= 0) & (hh + dy - 1 < H) &
              (ww + dx - 1 >= 0) & (ww + dx - 1 < W))
        m[t] = ok.astype(np.float32)
    return m


def _make_resblock_kernel(Nb, Cin, Cout, H, W, has_downsample, compute_dtype):
    M = H * W
    PAD = W + 1                                   # max |tap shift|
    shifts = [(t // 3 - 1) * W + (t % 3 - 1) for t in range(9)]

    def build_im2col(src, b, c, pad_s, im_s, mask_ref):
        # src: (c, M) f32.  Write it once into the lane-padded row buffer,
        # read the 9 shifted windows (static lane-offset slices), zero the
        # out-of-image taps with jnp.where, and store lane-dense im2col rows.
        pad_s[pl.ds(0, c), pl.ds(PAD, M)] = src
        for t, d in enumerate(shifts):
            tap = pad_s[pl.ds(0, c), pl.ds(PAD + d, M)]
            tap = jnp.where(mask_ref[pl.ds(t, 1), :] != 0.0, tap, 0.0)
            im_s[pl.ds(t * c, c), pl.ds(b * M, M)] = tap.astype(im_s.dtype)

    def kernel(mask_ref, x_ref, w1_ref, b1_ref, w2_ref, b2_ref, *rest):
        if has_downsample:
            wd_ref, bd_ref, o_ref, pad_s, im1_s, im2_s = rest
        else:
            o_ref, pad_s, im1_s, im2_s = rest

        # ---- stage 1: im2col of the input (lane-dense column writes) -------
        x_raw = []
        for b in range(Nb):
            xb = x_ref[pl.ds(b * Cin, Cin), :].astype(jnp.float32)
            if has_downsample:
                # Downsample conv needs the PRE-ReLU input -> share raw taps.
                src = xb
            else:
                # Identity path: ReLU once on the (Cin, M) tile, keep raw x
                # for the residual add.
                x_raw.append(xb)
                src = jnp.maximum(xb, 0.0)
            build_im2col(src, b, Cin, pad_s, im1_s, mask_ref)

        im1 = im1_s[...]                               # (9*Cin, Nb*M)
        if has_downsample:
            ident = jnp.dot(wd_ref[...], im1,
                            preferred_element_type=jnp.float32) + bd_ref[...]
            conv1_in = jnp.maximum(im1, 0)             # == im2col(relu(x))
        else:
            conv1_in = im1

        # ---- conv1 + bias + relu: single MXU matmul, K = 9*Cin --------------
        r1 = jnp.dot(w1_ref[...], conv1_in,
                     preferred_element_type=jnp.float32) + b1_ref[...]
        r1 = jnp.maximum(r1, 0.0)                      # (Cout, Nb*M) f32, VMEM only

        # ---- stage 2: im2col of relu(r1), then conv2: K = 9*Cout ------------
        for b in range(Nb):
            build_im2col(r1[:, b * M:(b + 1) * M], b, Cout, pad_s, im2_s,
                         mask_ref)
        r2 = jnp.dot(w2_ref[...], im2_s[...],
                     preferred_element_type=jnp.float32) + b2_ref[...]

        # ---- residual add + lane-dense output store --------------------------
        for b in range(Nb):
            res = r2[:, b * M:(b + 1) * M]
            if has_downsample:
                res = res + ident[:, b * M:(b + 1) * M]
            else:
                res = res + x_raw[b]
            o_ref[pl.ds(b * Cout, Cout), :] = res.astype(o_ref.dtype)

    return kernel


def resblock_pallas(x_nchw, w1, b1, w2, b2, wd=None, bd=None, *, stride=1,
                    compute_dtype=jnp.float32, images_per_step=None):
    """Fused ResBlock forward.  x is NCHW; weights are HWIO (3, 3, ci, co)."""
    if stride != 1:
        # TODO(synk): strided conv path not implemented in the fused kernel.
        raise NotImplementedError("resblock_pallas only supports stride=1")

    N, Cin, H, W = x_nchw.shape
    Cout = w1.shape[-1]
    has_downsample = wd is not None
    if not has_downsample:
        assert Cin == Cout, "identity path needs matching channel dims"

    M = H * W
    Nb = N if images_per_step is None else images_per_step
    assert N % Nb == 0, "images_per_step must divide the batch"
    if Nb != N:
        assert (Nb * Cin) % 8 == 0 and (Nb * Cout) % 8 == 0, (
            "per-step row blocks must be 8-sublane aligned unless the whole "
            "batch is processed in one grid step")
    grid = (N // Nb,)

    # Free row-major reshape (no transpose): NCHW -> (N*C, H*W).
    x2d = x_nchw.reshape(N * Cin, M)

    # im2col weight layout: contraction index ordered (tap, cin); lhs is
    # (Cout, 9*Cin) so the matmul result lands channels-on-sublanes /
    # spatial-on-lanes (lane-dense output).
    w1_m = w1.reshape(9 * Cin, Cout).T.astype(compute_dtype)
    w2_m = w2.reshape(9 * Cout, Cout).T.astype(compute_dtype)
    b1_m = b1.reshape(Cout, 1).astype(jnp.float32)
    b2_m = b2.reshape(Cout, 1).astype(jnp.float32)
    masks = jnp.asarray(_tap_masks(H, W))

    def _full(arr):
        shape = arr.shape
        return pl.BlockSpec(shape, lambda i: (0,) * len(shape))

    args = [masks, x2d, w1_m, b1_m, w2_m, b2_m]
    in_specs = [_full(masks),
                pl.BlockSpec((Nb * Cin, M), lambda i: (i, 0)),
                _full(w1_m), _full(b1_m), _full(w2_m), _full(b2_m)]
    if has_downsample:
        wd_m = wd.reshape(9 * Cin, Cout).T.astype(compute_dtype)
        bd_m = bd.reshape(Cout, 1).astype(jnp.float32)
        args += [wd_m, bd_m]
        in_specs += [_full(wd_m), _full(bd_m)]

    kernel = _make_resblock_kernel(Nb, Cin, Cout, H, W, has_downsample,
                                   compute_dtype)

    scratch_shapes = [
        pltpu.VMEM((max(Cin, Cout), M + 2 * (W + 1)), jnp.float32),  # row buf
        pltpu.VMEM((9 * Cin, Nb * M), compute_dtype),                # im2col 1
        pltpu.VMEM((9 * Cout, Nb * M), compute_dtype),               # im2col 2
    ]

    # Advisory cost estimate so XLA schedules surrounding ops sensibly.
    flops = 2 * Cout * 9 * Cin * N * M + 2 * Cout * 9 * Cout * N * M
    if has_downsample:
        flops += 2 * Cout * 9 * Cin * N * M
    bytes_accessed = sum(int(a.size) * int(a.dtype.itemsize) for a in args)
    bytes_accessed += int(N * Cout * M) * int(x_nchw.dtype.itemsize)
    cost = pl.CostEstimate(flops=int(flops), transcendentals=0,
                           bytes_accessed=int(bytes_accessed))

    out2d = pl.pallas_call(
        kernel,
        out_shape=jax.ShapeDtypeStruct((N * Cout, M), x_nchw.dtype),
        grid=grid,
        in_specs=in_specs,
        out_specs=pl.BlockSpec((Nb * Cout, M), lambda i: (i, 0)),
        scratch_shapes=scratch_shapes,
        compiler_params=pltpu.CompilerParams(
            dimension_semantics=("parallel",)),
        cost_estimate=cost,
    )(*args)

    # Free row-major reshape back to NCHW.
    return out2d.reshape(N, Cout, H, W)


def _init_conv_params(key, cin, cout):
    """Deterministic init mimicking PyTorch Conv2d defaults (kaiming uniform)."""
    kw, kb = jax.random.split(key)
    bound = 1.0 / np.sqrt(cin * 9)
    w = jax.random.uniform(kw, (3, 3, cin, cout), jnp.float32, -bound, bound)
    b = jax.random.uniform(kb, (cout,), jnp.float32, -bound, bound)
    return w, b


class ResBlockPallas:
    """Pallas equivalent of the PyTorch ResBlock forward pass.

    `backbone` only toggles in-place ReLU in PyTorch; numerically the forward
    is identical, so it is ignored here.
    """

    def __init__(self, backbone, indim, outdim=None, stride=1,
                 key=jax.random.PRNGKey(42), compute_dtype=jnp.float32):
        self.backbone = backbone
        if outdim is None:
            outdim = indim
        self.indim, self.outdim, self.stride = indim, outdim, stride
        self.compute_dtype = compute_dtype
        k1, k2, k3 = jax.random.split(key, 3)
        self.w1, self.b1 = _init_conv_params(k1, indim, outdim)
        self.w2, self.b2 = _init_conv_params(k2, outdim, outdim)
        if indim == outdim and stride == 1:
            self.wd, self.bd = None, None
        else:
            self.wd, self.bd = _init_conv_params(k3, indim, outdim)

    def __call__(self, x_nchw):
        return resblock_pallas(x_nchw, self.w1, self.b1, self.w2, self.b2,
                               self.wd, self.bd, stride=self.stride,
                               compute_dtype=self.compute_dtype)


# ----------------------------- reference (plain JAX, for verification) ------
def _ref_conv(x_nhwc, w_hwio, b, stride):
    y = lax.conv_general_dilated(
        x_nhwc, w_hwio, (stride, stride), [(1, 1), (1, 1)],
        dimension_numbers=("NHWC", "HWIO", "NHWC"))
    return y + b


def _ref_resblock(block, x_nchw):
    x = jnp.transpose(x_nchw, (0, 2, 3, 1))
    r = _ref_conv(jnp.maximum(x, 0.0), block.w1, block.b1, block.stride)
    r = _ref_conv(jnp.maximum(r, 0.0), block.w2, block.b2, 1)
    if block.wd is None:
        ident = x
    else:
        ident = _ref_conv(x, block.wd, block.bd, block.stride)
    return jnp.transpose(ident + r, (0, 3, 1, 2))


if __name__ == "__main__":
    key = jax.random.PRNGKey(0)
    N, C, H, W = 2, 4, 16, 16
    x = jax.random.normal(key, (N, C, H, W), jnp.float32)

    # 1) default path: indim == outdim, stride == 1 -> downsample is None.
    blk = ResBlockPallas("resnet", indim=C)
    out = jax.block_until_ready(blk(x))
    ref = jax.block_until_ready(_ref_resblock(blk, x))
    assert out.shape == (N, C, H, W)
    np.testing.assert_allclose(np.asarray(out), np.asarray(ref),
                               rtol=1e-3, atol=1e-3)

    # 2) channel-changing path: the fused downsample conv is active.
    blk_ds = ResBlockPallas("resnet", indim=C, outdim=8, stride=1,
                            key=jax.random.PRNGKey(7))
    out_ds = jax.block_until_ready(blk_ds(x))
    ref_ds = jax.block_until_ready(_ref_resblock(blk_ds, x))
    assert out_ds.shape == (N, 8, H, W)
    np.testing.assert_allclose(np.asarray(out_ds), np.asarray(ref_ds),
                               rtol=1e-3, atol=1e-3)

    # 3) bf16-MXU variant (same weights as blk): bf16 matmul operands / im2col
    #    scratch, f32 accumulation and f32 bias/ReLU/residual.
    blk_bf16 = ResBlockPallas("resnet", indim=C, compute_dtype=jnp.bfloat16)
    out_bf = jax.block_until_ready(blk_bf16(x))
    np.testing.assert_allclose(np.asarray(out_bf), np.asarray(ref),
                               rtol=5e-2, atol=5e-2)

    print("KERNEL_OK")
</pallas_src>

<mosaic_0001>
module attributes {stable_mosaic.version = 11 : i64} {
  func.func @kernel(%arg0: i32, %arg1: memref<9x256xf32, #tpu.memory_space<vmem>>, %arg2: memref<8x256xf32, #tpu.memory_space<vmem>>, %arg3: memref<4x36xf32, #tpu.memory_space<vmem>>, %arg4: memref<4x1xf32, #tpu.memory_space<vmem>>, %arg5: memref<4x36xf32, #tpu.memory_space<vmem>>, %arg6: memref<4x1xf32, #tpu.memory_space<vmem>>, %arg7: memref<8x256xf32, #tpu.memory_space<vmem>>, %arg8: memref<4x290xf32, #tpu.memory_space<vmem>>, %arg9: memref<36x512xf32, #tpu.memory_space<vmem>>, %arg10: memref<36x512xf32, #tpu.memory_space<vmem>>) attributes {dimension_semantics = [#tpu.dimension_semantics<parallel>], iteration_bounds = array<i64: 1>, scalar_prefetch = 0 : i64, scratch_operands = 3 : i64, tpu.core_type = #tpu.core_type<tc>, window_params = [{pipeline_mode = #tpu.pipeline_mode<synchronous>, transform_indices = @transform_0, window_bounds = array<i64: 9, 256>}, {transform_indices = @transform_1, window_bounds = array<i64: 8, 256>}, {pipeline_mode = #tpu.pipeline_mode<synchronous>, transform_indices = @transform_2, window_bounds = array<i64: 4, 36>}, {pipeline_mode = #tpu.pipeline_mode<synchronous>, transform_indices = @transform_3, window_bounds = array<i64: 4, 1>}, {pipeline_mode = #tpu.pipeline_mode<synchronous>, transform_indices = @transform_4, window_bounds = array<i64: 4, 36>}, {pipeline_mode = #tpu.pipeline_mode<synchronous>, transform_indices = @transform_5, window_bounds = array<i64: 4, 1>}, {transform_indices = @transform_6, window_bounds = array<i64: 8, 256>}]} {
    %c0 = arith.constant 0 : index
    %c0_0 = arith.constant 0 : index
    %0 = vector.load %arg2[%c0, %c0_0] : memref<8x256xf32, #tpu.memory_space<vmem>>, vector<4x256xf32>
    %cst = arith.constant 0.000000e+00 : f32
    %1 = vector.broadcast %cst : f32 to vector<4x256xf32>
    %2 = arith.maximumf %0, %1 : vector<4x256xf32>
    %c0_1 = arith.constant 0 : index
    %c17 = arith.constant 17 : index
    %3 = vector.load %arg8[%c0_1, %c17] : memref<4x290xf32, #tpu.memory_space<vmem>>, vector<4x256xf32>
    tpu.vector_store %arg8[%c0_1, %c17], %2 {strides = array<i32>} : memref<4x290xf32, #tpu.memory_space<vmem>>, vector<4x256xf32>,
    %c0_2 = arith.constant 0 : index
    %c0_3 = arith.constant 0 : index
    %4 = vector.load %arg8[%c0_2, %c0_3] : memref<4x290xf32, #tpu.memory_space<vmem>>, vector<4x256xf32>
    %c0_4 = arith.constant 0 : index
    %c0_5 = arith.constant 0 : index
    %5 = vector.load %arg1[%c0_4, %c0_5] : memref<9x256xf32, #tpu.memory_space<vmem>>, vector<1x256xf32>
    %cst_6 = arith.constant 0.000000e+00 : f32
    %6 = vector.broadcast %cst_6 : f32 to vector<1x256xf32>
    %7 = arith.cmpf one, %5, %6 : vector<1x256xf32>
    %cst_7 = arith.constant 0.000000e+00 : f32
    %8 = vector.shape_cast %7 : vector<1x256xi1> to vector<1x256xi1>
    %9 = vector.broadcast %8 : vector<1x256xi1> to vector<4x256xi1>
    %10 = vector.broadcast %cst_7 : f32 to vector<4x256xf32>
    %11 = arith.select %9, %4, %10 : vector<4x256xi1>, vector<4x256xf32>
    %c0_8 = arith.constant 0 : index
    %c0_9 = arith.constant 0 : index
    %12 = vector.load %arg9[%c0_8, %c0_9] : memref<36x512xf32, #tpu.memory_space<vmem>>, vector<4x256xf32>
    tpu.vector_store %arg9[%c0_8, %c0_9], %11 {strides = array<i32>} : memref<36x512xf32, #tpu.memory_space<vmem>>, vector<4x256xf32>,
    %c0_10 = arith.constant 0 : index
    %c1 = arith.constant 1 : index
    %13 = vector.load %arg8[%c0_10, %c1] : memref<4x290xf32, #tpu.memory_space<vmem>>, vector<4x256xf32>
    %c1_11 = arith.constant 1 : index
    %c0_12 = arith.constant 0 : index
    %14 = vector.load %arg1[%c1_11, %c0_12] : memref<9x256xf32, #tpu.memory_space<vmem>>, vector<1x256xf32>
    %cst_13 = arith.constant 0.000000e+00 : f32
    %15 = vector.broadcast %cst_13 : f32 to vector<1x256xf32>
    %16 = arith.cmpf one, %14, %15 : vector<1x256xf32>
    %cst_14 = arith.constant 0.000000e+00 : f32
    %17 = vector.shape_cast %16 : vector<1x256xi1> to vector<1x256xi1>
    %18 = vector.broadcast %17 : vector<1x256xi1> to vector<4x256xi1>
    %19 = vector.broadcast %cst_14 : f32 to vector<4x256xf32>
    %20 = arith.select %18, %13, %19 : vector<4x256xi1>, vector<4x256xf32>
    %c4 = arith.constant 4 : index
    %c0_15 = arith.constant 0 : index
    %21 = vector.load %arg9[%c4, %c0_15] : memref<36x512xf32, #tpu.memory_space<vmem>>, vector<4x256xf32>
    tpu.vector_store %arg9[%c4, %c0_15], %20 {strides = array<i32>} : memref<36x512xf32, #tpu.memory_space<vmem>>, vector<4x256xf32>,
    %c0_16 = arith.constant 0 : index
    %c2 = arith.constant 2 : index
    %22 = vector.load %arg8[%c0_16, %c2] : memref<4x290xf32, #tpu.memory_space<vmem>>, vector<4x256xf32>
    %c2_17 = arith.constant 2 : index
    %c0_18 = arith.constant 0 : index
    %23 = vector.load %arg1[%c2_17, %c0_18] : memref<9x256xf32, #tpu.memory_space<vmem>>, vector<1x256xf32>
    %cst_19 = arith.constant 0.000000e+00 : f32
    %24 = vector.broadcast %cst_19 : f32 to vector<1x256xf32>
    %25 = arith.cmpf one, %23, %24 : vector<1x256xf32>
    %cst_20 = arith.constant 0.000000e+00 : f32
    %26 = vector.shape_cast %25 : vector<1x256xi1> to vector<1x256xi1>
    %27 = vector.broadcast %26 : vector<1x256xi1> to vector<4x256xi1>
    %28 = vector.broadcast %cst_20 : f32 to vector<4x256xf32>
    %29 = arith.select %27, %22, %28 : vector<4x256xi1>, vector<4x256xf32>
    %c8 = arith.constant 8 : index
    %c0_21 = arith.constant 0 : index
    %30 = vector.load %arg9[%c8, %c0_21] : memref<36x512xf32, #tpu.memory_space<vmem>>, vector<4x256xf32>
    tpu.vector_store %arg9[%c8, %c0_21], %29 {strides = array<i32>} : memref<36x512xf32, #tpu.memory_space<vmem>>, vector<4x256xf32>,
    %c0_22 = arith.constant 0 : index
    %c16 = arith.constant 16 : index
    %31 = vector.load %arg8[%c0_22, %c16] : memref<4x290xf32, #tpu.memory_space<vmem>>, vector<4x256xf32>
    %c3 = arith.constant 3 : index
    %c0_23 = arith.constant 0 : index
    %32 = vector.load %arg1[%c3, %c0_23] : memref<9x256xf32, #tpu.memory_space<vmem>>, vector<1x256xf32>
    %cst_24 = arith.constant 0.000000e+00 : f32
    %33 = vector.broadcast %cst_24 : f32 to vector<1x256xf32>
    %34 = arith.cmpf one, %32, %33 : vector<1x256xf32>
    %cst_25 = arith.constant 0.000000e+00 : f32
    %35 = vector.shape_cast %34 : vector<1x256xi1> to vector<1x256xi1>
    %36 = vector.broadcast %35 : vector<1x256xi1> to vector<4x256xi1>
    %37 = vector.broadcast %cst_25 : f32 to vector<4x256xf32>
    %38 = arith.select %36, %31, %37 : vector<4x256xi1>, vector<4x256xf32>
    %c12 = arith.constant 12 : index
    %c0_26 = arith.constant 0 : index
    %39 = vector.load %arg9[%c12, %c0_26] : memref<36x512xf32, #tpu.memory_space<vmem>>, vector<4x256xf32>
    tpu.vector_store %arg9[%c12, %c0_26], %38 {strides = array<i32>} : memref<36x512xf32, #tpu.memory_space<vmem>>, vector<4x256xf32>,
    %c0_27 = arith.constant 0 : index
    %c17_28 = arith.constant 17 : index
    %40 = vector.load %arg8[%c0_27, %c17_28] : memref<4x290xf32, #tpu.memory_space<vmem>>, vector<4x256xf32>
    %c4_29 = arith.constant 4 : index
    %c0_30 = arith.constant 0 : index
    %41 = vector.load %arg1[%c4_29, %c0_30] : memref<9x256xf32, #tpu.memory_space<vmem>>, vector<1x256xf32>
    %cst_31 = arith.constant 0.000000e+00 : f32
    %42 = vector.broadcast %cst_31 : f32 to vector<1x256xf32>
    %43 = arith.cmpf one, %41, %42 : vector<1x256xf32>
    %cst_32 = arith.constant 0.000000e+00 : f32
    %44 = vector.shape_cast %43 : vector<1x256xi1> to vector<1x256xi1>
    %45 = vector.broadcast %44 : vector<1x256xi1> to vector<4x256xi1>
    %46 = vector.broadcast %cst_32 : f32 to vector<4x256xf32>
    %47 = arith.select %45, %40, %46 : vector<4x256xi1>, vector<4x256xf32>
    %c16_33 = arith.constant 16 : index
    %c0_34 = arith.constant 0 : index
    %48 = vector.load %arg9[%c16_33, %c0_34] : memref<36x512xf32, #tpu.memory_space<vmem>>, vector<4x256xf32>
    tpu.vector_store %arg9[%c16_33, %c0_34], %47 {strides = array<i32>} : memref<36x512xf32, #tpu.memory_space<vmem>>, vector<4x256xf32>,
    %c0_35 = arith.constant 0 : index
    %c18 = arith.constant 18 : index
    %49 = vector.load %arg8[%c0_35, %c18] : memref<4x290xf32, #tpu.memory_space<vmem>>, vector<4x256xf32>
    %c5 = arith.constant 5 : index
    %c0_36 = arith.constant 0 : index
    %50 = vector.load %arg1[%c5, %c0_36] : memref<9x256xf32, #tpu.memory_space<vmem>>, vector<1x256xf32>
    %cst_37 = arith.constant 0.000000e+00 : f32
    %51 = vector.broadcast %cst_37 : f32 to vector<1x256xf32>
    %52 = arith.cmpf one, %50, %51 : vector<1x256xf32>
    %cst_38 = arith.constant 0.000000e+00 : f32
    %53 = vector.shape_cast %52 : vector<1x256xi1> to vector<1x256xi1>
    %54 = vector.broadcast %53 : vector<1x256xi1> to vector<4x256xi1>
    %55 = vector.broadcast %cst_38 : f32 to vector<4x256xf32>
    %56 = arith.select %54, %49, %55 : vector<4x256xi1>, vector<4x256xf32>
    %c20 = arith.constant 20 : index
    %c0_39 = arith.constant 0 : index
    %57 = vector.load %arg9[%c20, %c0_39] : memref<36x512xf32, #tpu.memory_space<vmem>>, vector<4x256xf32>
    tpu.vector_store %arg9[%c20, %c0_39], %56 {strides = array<i32>} : memref<36x512xf32, #tpu.memory_space<vmem>>, vector<4x256xf32>,
    %c0_40 = arith.constant 0 : index
    %c32 = arith.constant 32 : index
    %58 = vector.load %arg8[%c0_40, %c32] : memref<4x290xf32, #tpu.memory_space<vmem>>, vector<4x256xf32>
    %c6 = arith.constant 6 : index
    %c0_41 = arith.constant 0 : index
    %59 = vector.load %arg1[%c6, %c0_41] : memref<9x256xf32, #tpu.memory_space<vmem>>, vector<1x256xf32>
    %cst_42 = arith.constant 0.000000e+00 : f32
    %60 = vector.broadcast %cst_42 : f32 to vector<1x256xf32>
    %61 = arith.cmpf one, %59, %60 : vector<1x256xf32>
    %cst_43 = arith.constant 0.000000e+00 : f32
    %62 = vector.shape_cast %61 : vector<1x256xi1> to vector<1x256xi1>
    %63 = vector.broadcast %62 : vector<1x256xi1> to vector<4x256xi1>
    %64 = vector.broadcast %cst_43 : f32 to vector<4x256xf32>
    %65 = arith.select %63, %58, %64 : vector<4x256xi1>, vector<4x256xf32>
    %c24 = arith.constant 24 : index
    %c0_44 = arith.constant 0 : index
    %66 = vector.load %arg9[%c24, %c0_44] : memref<36x512xf32, #tpu.memory_space<vmem>>, vector<4x256xf32>
    tpu.vector_store %arg9[%c24, %c0_44], %65 {strides = array<i32>} : memref<36x512xf32, #tpu.memory_space<vmem>>, vector<4x256xf32>,
    %c0_45 = arith.constant 0 : index
    %c33 = arith.constant 33 : index
    %67 = vector.load %arg8[%c0_45, %c33] : memref<4x290xf32, #tpu.memory_space<vmem>>, vector<4x256xf32>
    %c7 = arith.constant 7 : index
    %c0_46 = arith.constant 0 : index
    %68 = vector.load %arg1[%c7, %c0_46] : memref<9x256xf32, #tpu.memory_space<vmem>>, vector<1x256xf32>
    %cst_47 = arith.constant 0.000000e+00 : f32
    %69 = vector.broadcast %cst_47 : f32 to vector<1x256xf32>
    %70 = arith.cmpf one, %68, %69 : vector<1x256xf32>
    %cst_48 = arith.constant 0.000000e+00 : f32
    %71 = vector.shape_cast %70 : vector<1x256xi1> to vector<1x256xi1>
    %72 = vector.broadcast %71 : vector<1x256xi1> to vector<4x256xi1>
    %73 = vector.broadcast %cst_48 : f32 to vector<4x256xf32>
    %74 = arith.select %72, %67, %73 : vector<4x256xi1>, vector<4x256xf32>
    %c28 = arith.constant 28 : index
    %c0_49 = arith.constant 0 : index
    %75 = vector.load %arg9[%c28, %c0_49] : memref<36x512xf32, #tpu.memory_space<vmem>>, vector<4x256xf32>
    tpu.vector_store %arg9[%c28, %c0_49], %74 {strides = array<i32>} : memref<36x512xf32, #tpu.memory_space<vmem>>, vector<4x256xf32>,
    %c0_50 = arith.constant 0 : index
    %c34 = arith.constant 34 : index
    %76 = vector.load %arg8[%c0_50, %c34] : memref<4x290xf32, #tpu.memory_space<vmem>>, vector<4x256xf32>
    %c8_51 = arith.constant 8 : index
    %c0_52 = arith.constant 0 : index
    %77 = vector.load %arg1[%c8_51, %c0_52] : memref<9x256xf32, #tpu.memory_space<vmem>>, vector<1x256xf32>
    %cst_53 = arith.constant 0.000000e+00 : f32
    %78 = vector.broadcast %cst_53 : f32 to vector<1x256xf32>
    %79 = arith.cmpf one, %77, %78 : vector<1x256xf32>
    %cst_54 = arith.constant 0.000000e+00 : f32
    %80 = vector.shape_cast %79 : vector<1x256xi1> to vector<1x256xi1>
    %81 = vector.broadcast %80 : vector<1x256xi1> to vector<4x256xi1>
    %82 = vector.broadcast %cst_54 : f32 to vector<4x256xf32>
    %83 = arith.select %81, %76, %82 : vector<4x256xi1>, vector<4x256xf32>
    %c32_55 = arith.constant 32 : index
    %c0_56 = arith.constant 0 : index
    %84 = vector.load %arg9[%c32_55, %c0_56] : memref<36x512xf32, #tpu.memory_space<vmem>>, vector<4x256xf32>
    tpu.vector_store %arg9[%c32_55, %c0_56], %83 {strides = array<i32>} : memref<36x512xf32, #tpu.memory_space<vmem>>, vector<4x256xf32>,
    %c4_57 = arith.constant 4 : index
    %c0_58 = arith.constant 0 : index
    %85 = vector.load %arg2[%c4_57, %c0_58] : memref<8x256xf32, #tpu.memory_space<vmem>>, vector<4x256xf32>
    %cst_59 = arith.constant 0.000000e+00 : f32
    %86 = vector.broadcast %cst_59 : f32 to vector<4x256xf32>
    %87 = arith.maximumf %85, %86 : vector<4x256xf32>
    %c0_60 = arith.constant 0 : index
    %c17_61 = arith.constant 17 : index
    %88 = vector.load %arg8[%c0_60, %c17_61] : memref<4x290xf32, #tpu.memory_space<vmem>>, vector<4x256xf32>
    tpu.vector_store %arg8[%c0_60, %c17_61], %87 {strides = array<i32>} : memref<4x290xf32, #tpu.memory_space<vmem>>, vector<4x256xf32>,
    %c0_62 = arith.constant 0 : index
    %c0_63 = arith.constant 0 : index
    %89 = vector.load %arg8[%c0_62, %c0_63] : memref<4x290xf32, #tpu.memory_space<vmem>>, vector<4x256xf32>
    %c0_64 = arith.constant 0 : index
    %c0_65 = arith.constant 0 : index
    %90 = vector.load %arg1[%c0_64, %c0_65] : memref<9x256xf32, #tpu.memory_space<vmem>>, vector<1x256xf32>
    %cst_66 = arith.constant 0.000000e+00 : f32
    %91 = vector.broadcast %cst_66 : f32 to vector<1x256xf32>
    %92 = arith.cmpf one, %90, %91 : vector<1x256xf32>
    %cst_67 = arith.constant 0.000000e+00 : f32
    %93 = vector.shape_cast %92 : vector<1x256xi1> to vector<1x256xi1>
    %94 = vector.broadcast %93 : vector<1x256xi1> to vector<4x256xi1>
    %95 = vector.broadcast %cst_67 : f32 to vector<4x256xf32>
    %96 = arith.select %94, %89, %95 : vector<4x256xi1>, vector<4x256xf32>
    %c0_68 = arith.constant 0 : index
    %c256 = arith.constant 256 : index
    %97 = vector.load %arg9[%c0_68, %c256] : memref<36x512xf32, #tpu.memory_space<vmem>>, vector<4x256xf32>
    tpu.vector_store %arg9[%c0_68, %c256], %96 {strides = array<i32>} : memref<36x512xf32, #tpu.memory_space<vmem>>, vector<4x256xf32>,
    %c0_69 = arith.constant 0 : index
    %c1_70 = arith.constant 1 : index
    %98 = vector.load %arg8[%c0_69, %c1_70] : memref<4x290xf32, #tpu.memory_space<vmem>>, vector<4x256xf32>
    %c1_71 = arith.constant 1 : index
    %c0_72 = arith.constant 0 : index
    %99 = vector.load %arg1[%c1_71, %c0_72] : memref<9x256xf32, #tpu.memory_space<vmem>>, vector<1x256xf32>
    %cst_73 = arith.constant 0.000000e+00 : f32
    %100 = vector.broadcast %cst_73 : f32 to vector<1x256xf32>
    %101 = arith.cmpf one, %99, %100 : vector<1x256xf32>
    %cst_74 = arith.constant 0.000000e+00 : f32
    %102 = vector.shape_cast %101 : vector<1x256xi1> to vector<1x256xi1>
    %103 = vector.broadcast %102 : vector<1x256xi1> to vector<4x256xi1>
    %104 = vector.broadcast %cst_74 : f32 to vector<4x256xf32>
    %105 = arith.select %103, %98, %104 : vector<4x256xi1>, vector<4x256xf32>
    %c4_75 = arith.constant 4 : index
    %c256_76 = arith.constant 256 : index
    %106 = vector.load %arg9[%c4_75, %c256_76] : memref<36x512xf32, #tpu.memory_space<vmem>>, vector<4x256xf32>
    tpu.vector_store %arg9[%c4_75, %c256_76], %105 {strides = array<i32>} : memref<36x512xf32, #tpu.memory_space<vmem>>, vector<4x256xf32>,
    %c0_77 = arith.constant 0 : index
    %c2_78 = arith.constant 2 : index
    %107 = vector.load %arg8[%c0_77, %c2_78] : memref<4x290xf32, #tpu.memory_space<vmem>>, vector<4x256xf32>
    %c2_79 = arith.constant 2 : index
    %c0_80 = arith.constant 0 : index
    %108 = vector.load %arg1[%c2_79, %c0_80] : memref<9x256xf32, #tpu.memory_space<vmem>>, vector<1x256xf32>
    %cst_81 = arith.constant 0.000000e+00 : f32
    %109 = vector.broadcast %cst_81 : f32 to vector<1x256xf32>
    %110 = arith.cmpf one, %108, %109 : vector<1x256xf32>
    %cst_82 = arith.constant 0.000000e+00 : f32
    %111 = vector.shape_cast %110 : vector<1x256xi1> to vector<1x256xi1>
    %112 = vector.broadcast %111 : vector<1x256xi1> to vector<4x256xi1>
    %113 = vector.broadcast %cst_82 : f32 to vector<4x256xf32>
    %114 = arith.select %112, %107, %113 : vector<4x256xi1>, vector<4x256xf32>
    %c8_83 = arith.constant 8 : index
    %c256_84 = arith.constant 256 : index
    %115 = vector.load %arg9[%c8_83, %c256_84] : memref<36x512xf32, #tpu.memory_space<vmem>>, vector<4x256xf32>
    tpu.vector_store %arg9[%c8_83, %c256_84], %114 {strides = array<i32>} : memref<36x512xf32, #tpu.memory_space<vmem>>, vector<4x256xf32>,
    %c0_85 = arith.constant 0 : index
    %c16_86 = arith.constant 16 : index
    %116 = vector.load %arg8[%c0_85, %c16_86] : memref<4x290xf32, #tpu.memory_space<vmem>>, vector<4x256xf32>
    %c3_87 = arith.constant 3 : index
    %c0_88 = arith.constant 0 : index
    %117 = vector.load %arg1[%c3_87, %c0_88] : memref<9x256xf32, #tpu.memory_space<vmem>>, vector<1x256xf32>
    %cst_89 = arith.constant 0.000000e+00 : f32
    %118 = vector.broadcast %cst_89 : f32 to vector<1x256xf32>
    %119 = arith.cmpf one, %117, %118 : vector<1x256xf32>
    %cst_90 = arith.constant 0.000000e+00 : f32
    %120 = vector.shape_cast %119 : vector<1x256xi1> to vector<1x256xi1>
    %121 = vector.broadcast %120 : vector<1x256xi1> to vector<4x256xi1>
    %122 = vector.broadcast %cst_90 : f32 to vector<4x256xf32>
    %123 = arith.select %121, %116, %122 : vector<4x256xi1>, vector<4x256xf32>
    %c12_91 = arith.constant 12 : index
    %c256_92 = arith.constant 256 : index
    %124 = vector.load %arg9[%c12_91, %c256_92] : memref<36x512xf32, #tpu.memory_space<vmem>>, vector<4x256xf32>
    tpu.vector_store %arg9[%c12_91, %c256_92], %123 {strides = array<i32>} : memref<36x512xf32, #tpu.memory_space<vmem>>, vector<4x256xf32>,
    %c0_93 = arith.constant 0 : index
    %c17_94 = arith.constant 17 : index
    %125 = vector.load %arg8[%c0_93, %c17_94] : memref<4x290xf32, #tpu.memory_space<vmem>>, vector<4x256xf32>
    %c4_95 = arith.constant 4 : index
    %c0_96 = arith.constant 0 : index
    %126 = vector.load %arg1[%c4_95, %c0_96] : memref<9x256xf32, #tpu.memory_space<vmem>>, vector<1x256xf32>
    %cst_97 = arith.constant 0.000000e+00 : f32
    %127 = vector.broadcast %cst_97 : f32 to vector<1x256xf32>
    %128 = arith.cmpf one, %126, %127 : vector<1x256xf32>
    %cst_98 = arith.constant 0.000000e+00 : f32
    %129 = vector.shape_cast %128 : vector<1x256xi1> to vector<1x256xi1>
    %130 = vector.broadcast %129 : vector<1x256xi1> to vector<4x256xi1>
    %131 = vector.broadcast %cst_98 : f32 to vector<4x256xf32>
    %132 = arith.select %130, %125, %131 : vector<4x256xi1>, vector<4x256xf32>
    %c16_99 = arith.constant 16 : index
    %c256_100 = arith.constant 256 : index
    %133 = vector.load %arg9[%c16_99, %c256_100] : memref<36x512xf32, #tpu.memory_space<vmem>>, vector<4x256xf32>
    tpu.vector_store %arg9[%c16_99, %c256_100], %132 {strides = array<i32>} : memref<36x512xf32, #tpu.memory_space<vmem>>, vector<4x256xf32>,
    %c0_101 = arith.constant 0 : index
    %c18_102 = arith.constant 18 : index
    %134 = vector.load %arg8[%c0_101, %c18_102] : memref<4x290xf32, #tpu.memory_space<vmem>>, vector<4x256xf32>
    %c5_103 = arith.constant 5 : index
    %c0_104 = arith.constant 0 : index
    %135 = vector.load %arg1[%c5_103, %c0_104] : memref<9x256xf32, #tpu.memory_space<vmem>>, vector<1x256xf32>
    %cst_105 = arith.constant 0.000000e+00 : f32
    %136 = vector.broadcast %cst_105 : f32 to vector<1x256xf32>
    %137 = arith.cmpf one, %135, %136 : vector<1x256xf32>
    %cst_106 = arith.constant 0.000000e+00 : f32
    %138 = vector.shape_cast %137 : vector<1x256xi1> to vector<1x256xi1>
    %139 = vector.broadcast %138 : vector<1x256xi1> to vector<4x256xi1>
    %140 = vector.broadcast %cst_106 : f32 to vector<4x256xf32>
    %141 = arith.select %139, %134, %140 : vector<4x256xi1>, vector<4x256xf32>
    %c20_107 = arith.constant 20 : index
    %c256_108 = arith.constant 256 : index
    %142 = vector.load %arg9[%c20_107, %c256_108] : memref<36x512xf32, #tpu.memory_space<vmem>>, vector<4x256xf32>
    tpu.vector_store %arg9[%c20_107, %c256_108], %141 {strides = array<i32>} : memref<36x512xf32, #tpu.memory_space<vmem>>, vector<4x256xf32>,
    %c0_109 = arith.constant 0 : index
    %c32_110 = arith.constant 32 : index
    %143 = vector.load %arg8[%c0_109, %c32_110] : memref<4x290xf32, #tpu.memory_space<vmem>>, vector<4x256xf32>
    %c6_111 = arith.constant 6 : index
    %c0_112 = arith.constant 0 : index
    %144 = vector.load %arg1[%c6_111, %c0_112] : memref<9x256xf32, #tpu.memory_space<vmem>>, vector<1x256xf32>
    %cst_113 = arith.constant 0.000000e+00 : f32
    %145 = vector.broadcast %cst_113 : f32 to vector<1x256xf32>
    %146 = arith.cmpf one, %144, %145 : vector<1x256xf32>
    %cst_114 = arith.constant 0.000000e+00 : f32
    %147 = vector.shape_cast %146 : vector<1x256xi1> to vector<1x256xi1>
    %148 = vector.broadcast %147 : vector<1x256xi1> to vector<4x256xi1>
    %149 = vector.broadcast %cst_114 : f32 to vector<4x256xf32>
    %150 = arith.select %148, %143, %149 : vector<4x256xi1>, vector<4x256xf32>
    %c24_115 = arith.constant 24 : index
    %c256_116 = arith.constant 256 : index
    %151 = vector.load %arg9[%c24_115, %c256_116] : memref<36x512xf32, #tpu.memory_space<vmem>>, vector<4x256xf32>
    tpu.vector_store %arg9[%c24_115, %c256_116], %150 {strides = array<i32>} : memref<36x512xf32, #tpu.memory_space<vmem>>, vector<4x256xf32>,
    %c0_117 = arith.constant 0 : index
    %c33_118 = arith.constant 33 : index
    %152 = vector.load %arg8[%c0_117, %c33_118] : memref<4x290xf32, #tpu.memory_space<vmem>>, vector<4x256xf32>
    %c7_119 = arith.constant 7 : index
    %c0_120 = arith.constant 0 : index
    %153 = vector.load %arg1[%c7_119, %c0_120] : memref<9x256xf32, #tpu.memory_space<vmem>>, vector<1x256xf32>
    %cst_121 = arith.constant 0.000000e+00 : f32
    %154 = vector.broadcast %cst_121 : f32 to vector<1x256xf32>
    %155 = arith.cmpf one, %153, %154 : vector<1x256xf32>
    %cst_122 = arith.constant 0.000000e+00 : f32
    %156 = vector.shape_cast %155 : vector<1x256xi1> to vector<1x256xi1>
    %157 = vector.broadcast %156 : vector<1x256xi1> to vector<4x256xi1>
    %158 = vector.broadcast %cst_122 : f32 to vector<4x256xf32>
    %159 = arith.select %157, %152, %158 : vector<4x256xi1>, vector<4x256xf32>
    %c28_123 = arith.constant 28 : index
    %c256_124 = arith.constant 256 : index
    %160 = vector.load %arg9[%c28_123, %c256_124] : memref<36x512xf32, #tpu.memory_space<vmem>>, vector<4x256xf32>
    tpu.vector_store %arg9[%c28_123, %c256_124], %159 {strides = array<i32>} : memref<36x512xf32, #tpu.memory_space<vmem>>, vector<4x256xf32>,
    %c0_125 = arith.constant 0 : index
    %c34_126 = arith.constant 34 : index
    %161 = vector.load %arg8[%c0_125, %c34_126] : memref<4x290xf32, #tpu.memory_space<vmem>>, vector<4x256xf32>
    %c8_127 = arith.constant 8 : index
    %c0_128 = arith.constant 0 : index
    %162 = vector.load %arg1[%c8_127, %c0_128] : memref<9x256xf32, #tpu.memory_space<vmem>>, vector<1x256xf32>
    %cst_129 = arith.constant 0.000000e+00 : f32
    %163 = vector.broadcast %cst_129 : f32 to vector<1x256xf32>
    %164 = arith.cmpf one, %162, %163 : vector<1x256xf32>
    %cst_130 = arith.constant 0.000000e+00 : f32
    %165 = vector.shape_cast %164 : vector<1x256xi1> to vector<1x256xi1>
    %166 = vector.broadcast %165 : vector<1x256xi1> to vector<4x256xi1>
    %167 = vector.broadcast %cst_130 : f32 to vector<4x256xf32>
    %168 = arith.select %166, %161, %167 : vector<4x256xi1>, vector<4x256xf32>
    %c32_131 = arith.constant 32 : index
    %c256_132 = arith.constant 256 : index
    %169 = vector.load %arg9[%c32_131, %c256_132] : memref<36x512xf32, #tpu.memory_space<vmem>>, vector<4x256xf32>
    tpu.vector_store %arg9[%c32_131, %c256_132], %168 {strides = array<i32>} : memref<36x512xf32, #tpu.memory_space<vmem>>, vector<4x256xf32>,
    %c0_133 = arith.constant 0 : index
    %c0_134 = arith.constant 0 : index
    %170 = vector.load %arg9[%c0_133, %c0_134] : memref<36x512xf32, #tpu.memory_space<vmem>>, vector<36x512xf32>
    %c0_135 = arith.constant 0 : index
    %c0_136 = arith.constant 0 : index
    %171 = vector.load %arg3[%c0_135, %c0_136] : memref<4x36xf32, #tpu.memory_space<vmem>>, vector<4x36xf32>
    %cst_137 = arith.constant dense<0.000000e+00> : vector<4x512xf32>
    %172 = tpu.matmul %171, %170, %cst_137 {dimension_numbers = #tpu.dot_dimension_numbers<[1], [0], [0], [1], [0, 0, 1, 1], [], []>} : vector<4x36xf32>, vector<36x512xf32>, vector<4x512xf32> -> vector<4x512xf32>
    %c0_138 = arith.constant 0 : index
    %c0_139 = arith.constant 0 : index
    %173 = vector.load %arg4[%c0_138, %c0_139] : memref<4x1xf32, #tpu.memory_space<vmem>>, vector<4x1xf32>
    %174 = vector.broadcast %173 : vector<4x1xf32> to vector<4x512xf32>
    %175 = arith.addf %172, %174 : vector<4x512xf32>
    %cst_140 = arith.constant 0.000000e+00 : f32
    %176 = vector.broadcast %cst_140 : f32 to vector<4x512xf32>
    %177 = arith.maximumf %175, %176 : vector<4x512xf32>
    %178 = vector.extract_strided_slice %177 {offsets = [0, 0], sizes = [4, 256], strides = [1, 1]} : vector<4x512xf32> to vector<4x256xf32>
    %c0_141 = arith.constant 0 : index
    %c17_142 = arith.constant 17 : index
    %179 = vector.load %arg8[%c0_141, %c17_142] : memref<4x290xf32, #tpu.memory_space<vmem>>, vector<4x256xf32>
    tpu.vector_store %arg8[%c0_141, %c17_142], %178 {strides = array<i32>} : memref<4x290xf32, #tpu.memory_space<vmem>>, vector<4x256xf32>,
    %c0_143 = arith.constant 0 : index
    %c0_144 = arith.constant 0 : index
    %180 = vector.load %arg8[%c0_143, %c0_144] : memref<4x290xf32, #tpu.memory_space<vmem>>, vector<4x256xf32>
    %c0_145 = arith.constant 0 : index
    %c0_146 = arith.constant 0 : index
    %181 = vector.load %arg1[%c0_145, %c0_146] : memref<9x256xf32, #tpu.memory_space<vmem>>, vector<1x256xf32>
    %cst_147 = arith.constant 0.000000e+00 : f32
    %182 = vector.broadcast %cst_147 : f32 to vector<1x256xf32>
    %183 = arith.cmpf one, %181, %182 : vector<1x256xf32>
    %cst_148 = arith.constant 0.000000e+00 : f32
    %184 = vector.shape_cast %183 : vector<1x256xi1> to vector<1x256xi1>
    %185 = vector.broadcast %184 : vector<1x256xi1> to vector<4x256xi1>
    %186 = vector.broadcast %cst_148 : f32 to vector<4x256xf32>
    %187 = arith.select %185, %180, %186 : vector<4x256xi1>, vector<4x256xf32>
    %c0_149 = arith.constant 0 : index
    %c0_150 = arith.constant 0 : index
    %188 = vector.load %arg10[%c0_149, %c0_150] : memref<36x512xf32, #tpu.memory_space<vmem>>, vector<4x256xf32>
    tpu.vector_store %arg10[%c0_149, %c0_150], %187 {strides = array<i32>} : memref<36x512xf32, #tpu.memory_space<vmem>>, vector<4x256xf32>,
    %c0_151 = arith.constant 0 : index
    %c1_152 = arith.constant 1 : index
    %189 = vector.load %arg8[%c0_151, %c1_152] : memref<4x290xf32, #tpu.memory_space<vmem>>, vector<4x256xf32>
    %c1_153 = arith.constant 1 : index
    %c0_154 = arith.constant 0 : index
    %190 = vector.load %arg1[%c1_153, %c0_154] : memref<9x256xf32, #tpu.memory_space<vmem>>, vector<1x256xf32>
    %cst_155 = arith.constant 0.000000e+00 : f32
    %191 = vector.broadcast %cst_155 : f32 to vector<1x256xf32>
    %192 = arith.cmpf one, %190, %191 : vector<1x256xf32>
    %cst_156 = arith.constant 0.000000e+00 : f32
    %193 = vector.shape_cast %192 : vector<1x256xi1> to vector<1x256xi1>
    %194 = vector.broadcast %193 : vector<1x256xi1> to vector<4x256xi1>
    %195 = vector.broadcast %cst_156 : f32 to vector<4x256xf32>
    %196 = arith.select %194, %189, %195 : vector<4x256xi1>, vector<4x256xf32>
    %c4_157 = arith.constant 4 : index
    %c0_158 = arith.constant 0 : index
    %197 = vector.load %arg10[%c4_157, %c0_158] : memref<36x512xf32, #tpu.memory_space<vmem>>, vector<4x256xf32>
    tpu.vector_store %arg10[%c4_157, %c0_158], %196 {strides = array<i32>} : memref<36x512xf32, #tpu.memory_space<vmem>>, vector<4x256xf32>,
    %c0_159 = arith.constant 0 : index
    %c2_160 = arith.constant 2 : index
    %198 = vector.load %arg8[%c0_159, %c2_160] : memref<4x290xf32, #tpu.memory_space<vmem>>, vector<4x256xf32>
    %c2_161 = arith.constant 2 : index
    %c0_162 = arith.constant 0 : index
    %199 = vector.load %arg1[%c2_161, %c0_162] : memref<9x256xf32, #tpu.memory_space<vmem>>, vector<1x256xf32>
    %cst_163 = arith.constant 0.000000e+00 : f32
    %200 = vector.broadcast %cst_163 : f32 to vector<1x256xf32>
    %201 = arith.cmpf one, %199, %200 : vector<1x256xf32>
    %cst_164 = arith.constant 0.000000e+00 : f32
    %202 = vector.shape_cast %201 : vector<1x256xi1> to vector<1x256xi1>
    %203 = vector.broadcast %202 : vector<1x256xi1> to vector<4x256xi1>
    %204 = vector.broadcast %cst_164 : f32 to vector<4x256xf32>
    %205 = arith.select %203, %198, %204 : vector<4x256xi1>, vector<4x256xf32>
    %c8_165 = arith.constant 8 : index
    %c0_166 = arith.constant 0 : index
    %206 = vector.load %arg10[%c8_165, %c0_166] : memref<36x512xf32, #tpu.memory_space<vmem>>, vector<4x256xf32>
    tpu.vector_store %arg10[%c8_165, %c0_166], %205 {strides = array<i32>} : memref<36x512xf32, #tpu.memory_space<vmem>>, vector<4x256xf32>,
    %c0_167 = arith.constant 0 : index
    %c16_168 = arith.constant 16 : index
    %207 = vector.load %arg8[%c0_167, %c16_168] : memref<4x290xf32, #tpu.memory_space<vmem>>, vector<4x256xf32>
    %c3_169 = arith.constant 3 : index
    %c0_170 = arith.constant 0 : index
    %208 = vector.load %arg1[%c3_169, %c0_170] : memref<9x256xf32, #tpu.memory_space<vmem>>, vector<1x256xf32>
    %cst_171 = arith.constant 0.000000e+00 : f32
    %209 = vector.broadcast %cst_171 : f32 to vector<1x256xf32>
    %210 = arith.cmpf one, %208, %209 : vector<1x256xf32>
    %cst_172 = arith.constant 0.000000e+00 : f32
    %211 = vector.shape_cast %210 : vector<1x256xi1> to vector<1x256xi1>
    %212 = vector.broadcast %211 : vector<1x256xi1> to vector<4x256xi1>
    %213 = vector.broadcast %cst_172 : f32 to vector<4x256xf32>
    %214 = arith.select %212, %207, %213 : vector<4x256xi1>, vector<4x256xf32>
    %c12_173 = arith.constant 12 : index
    %c0_174 = arith.constant 0 : index
    %215 = vector.load %arg10[%c12_173, %c0_174] : memref<36x512xf32, #tpu.memory_space<vmem>>, vector<4x256xf32>
    tpu.vector_store %arg10[%c12_173, %c0_174], %214 {strides = array<i32>} : memref<36x512xf32, #tpu.memory_space<vmem>>, vector<4x256xf32>,
    %c0_175 = arith.constant 0 : index
    %c17_176 = arith.constant 17 : index
    %216 = vector.load %arg8[%c0_175, %c17_176] : memref<4x290xf32, #tpu.memory_space<vmem>>, vector<4x256xf32>
    %c4_177 = arith.constant 4 : index
    %c0_178 = arith.constant 0 : index
    %217 = vector.load %arg1[%c4_177, %c0_178] : memref<9x256xf32, #tpu.memory_space<vmem>>, vector<1x256xf32>
    %cst_179 = arith.constant 0.000000e+00 : f32
    %218 = vector.broadcast %cst_179 : f32 to vector<1x256xf32>
    %219 = arith.cmpf one, %217, %218 : vector<1x256xf32>
    %cst_180 = arith.constant 0.000000e+00 : f32
    %220 = vector.shape_cast %219 : vector<1x256xi1> to vector<1x256xi1>
    %221 = vector.broadcast %220 : vector<1x256xi1> to vector<4x256xi1>
    %222 = vector.broadcast %cst_180 : f32 to vector<4x256xf32>
    %223 = arith.select %221, %216, %222 : vector<4x256xi1>, vector<4x256xf32>
    %c16_181 = arith.constant 16 : index
    %c0_182 = arith.constant 0 : index
    %224 = vector.load %arg10[%c16_181, %c0_182] : memref<36x512xf32, #tpu.memory_space<vmem>>, vector<4x256xf32>
    tpu.vector_store %arg10[%c16_181, %c0_182], %223 {strides = array<i32>} : memref<36x512xf32, #tpu.memory_space<vmem>>, vector<4x256xf32>,
    %c0_183 = arith.constant 0 : index
    %c18_184 = arith.constant 18 : index
    %225 = vector.load %arg8[%c0_183, %c18_184] : memref<4x290xf32, #tpu.memory_space<vmem>>, vector<4x256xf32>
    %c5_185 = arith.constant 5 : index
    %c0_186 = arith.constant 0 : index
    %226 = vector.load %arg1[%c5_185, %c0_186] : memref<9x256xf32, #tpu.memory_space<vmem>>, vector<1x256xf32>
    %cst_187 = arith.constant 0.000000e+00 : f32
    %227 = vector.broadcast %cst_187 : f32 to vector<1x256xf32>
    %228 = arith.cmpf one, %226, %227 : vector<1x256xf32>
    %cst_188 = arith.constant 0.000000e+00 : f32
    %229 = vector.shape_cast %228 : vector<1x256xi1> to vector<1x256xi1>
    %230 = vector.broadcast %229 : vector<1x256xi1> to vector<4x256xi1>
    %231 = vector.broadcast %cst_188 : f32 to vector<4x256xf32>
    %232 = arith.select %230, %225, %231 : vector<4x256xi1>, vector<4x256xf32>
    %c20_189 = arith.constant 20 : index
    %c0_190 = arith.constant 0 : index
    %233 = vector.load %arg10[%c20_189, %c0_190] : memref<36x512xf32, #tpu.memory_space<vmem>>, vector<4x256xf32>
    tpu.vector_store %arg10[%c20_189, %c0_190], %232 {strides = array<i32>} : memref<36x512xf32, #tpu.memory_space<vmem>>, vector<4x256xf32>,
    %c0_191 = arith.constant 0 : index
    %c32_192 = arith.constant 32 : index
    %234 = vector.load %arg8[%c0_191, %c32_192] : memref<4x290xf32, #tpu.memory_space<vmem>>, vector<4x256xf32>
    %c6_193 = arith.constant 6 : index
    %c0_194 = arith.constant 0 : index
    %235 = vector.load %arg1[%c6_193, %c0_194] : memref<9x256xf32, #tpu.memory_space<vmem>>, vector<1x256xf32>
    %cst_195 = arith.constant 0.000000e+00 : f32
    %236 = vector.broadcast %cst_195 : f32 to vector<1x256xf32>
    %237 = arith.cmpf one, %235, %236 : vector<1x256xf32>
    %cst_196 = arith.constant 0.000000e+00 : f32
    %238 = vector.shape_cast %237 : vector<1x256xi1> to vector<1x256xi1>
    %239 = vector.broadcast %238 : vector<1x256xi1> to vector<4x256xi1>
    %240 = vector.broadcast %cst_196 : f32 to vector<4x256xf32>
    %241 = arith.select %239, %234, %240 : vector<4x256xi1>, vector<4x256xf32>
    %c24_197 = arith.constant 24 : index
    %c0_198 = arith.constant 0 : index
    %242 = vector.load %arg10[%c24_197, %c0_198] : memref<36x512xf32, #tpu.memory_space<vmem>>, vector<4x256xf32>
    tpu.vector_store %arg10[%c24_197, %c0_198], %241 {strides = array<i32>} : memref<36x512xf32, #tpu.memory_space<vmem>>, vector<4x256xf32>,
    %c0_199 = arith.constant 0 : index
    %c33_200 = arith.constant 33 : index
    %243 = vector.load %arg8[%c0_199, %c33_200] : memref<4x290xf32, #tpu.memory_space<vmem>>, vector<4x256xf32>
    %c7_201 = arith.constant 7 : index
    %c0_202 = arith.constant 0 : index
    %244 = vector.load %arg1[%c7_201, %c0_202] : memref<9x256xf32, #tpu.memory_space<vmem>>, vector<1x256xf32>
    %cst_203 = arith.constant 0.000000e+00 : f32
    %245 = vector.broadcast %cst_203 : f32 to vector<1x256xf32>
    %246 = arith.cmpf one, %244, %245 : vector<1x256xf32>
    %cst_204 = arith.constant 0.000000e+00 : f32
    %247 = vector.shape_cast %246 : vector<1x256xi1> to vector<1x256xi1>
    %248 = vector.broadcast %247 : vector<1x256xi1> to vector<4x256xi1>
    %249 = vector.broadcast %cst_204 : f32 to vector<4x256xf32>
    %250 = arith.select %248, %243, %249 : vector<4x256xi1>, vector<4x256xf32>
    %c28_205 = arith.constant 28 : index
    %c0_206 = arith.constant 0 : index
    %251 = vector.load %arg10[%c28_205, %c0_206] : memref<36x512xf32, #tpu.memory_space<vmem>>, vector<4x256xf32>
    tpu.vector_store %arg10[%c28_205, %c0_206], %250 {strides = array<i32>} : memref<36x512xf32, #tpu.memory_space<vmem>>, vector<4x256xf32>,
    %c0_207 = arith.constant 0 : index
    %c34_208 = arith.constant 34 : index
    %252 = vector.load %arg8[%c0_207, %c34_208] : memref<4x290xf32, #tpu.memory_space<vmem>>, vector<4x256xf32>
    %c8_209 = arith.constant 8 : index
    %c0_210 = arith.constant 0 : index
    %253 = vector.load %arg1[%c8_209, %c0_210] : memref<9x256xf32, #tpu.memory_space<vmem>>, vector<1x256xf32>
    %cst_211 = arith.constant 0.000000e+00 : f32
    %254 = vector.broadcast %cst_211 : f32 to vector<1x256xf32>
    %255 = arith.cmpf one, %253, %254 : vector<1x256xf32>
    %cst_212 = arith.constant 0.000000e+00 : f32
    %256 = vector.shape_cast %255 : vector<1x256xi1> to vector<1x256xi1>
    %257 = vector.broadcast %256 : vector<1x256xi1> to vector<4x256xi1>
    %258 = vector.broadcast %cst_212 : f32 to vector<4x256xf32>
    %259 = arith.select %257, %252, %258 : vector<4x256xi1>, vector<4x256xf32>
    %c32_213 = arith.constant 32 : index
    %c0_214 = arith.constant 0 : index
    %260 = vector.load %arg10[%c32_213, %c0_214] : memref<36x512xf32, #tpu.memory_space<vmem>>, vector<4x256xf32>
    tpu.vector_store %arg10[%c32_213, %c0_214], %259 {strides = array<i32>} : memref<36x512xf32, #tpu.memory_space<vmem>>, vector<4x256xf32>,
    %261 = vector.extract_strided_slice %177 {offsets = [0, 256], sizes = [4, 256], strides = [1, 1]} : vector<4x512xf32> to vector<4x256xf32>
    %c0_215 = arith.constant 0 : index
    %c17_216 = arith.constant 17 : index
    %262 = vector.load %arg8[%c0_215, %c17_216] : memref<4x290xf32, #tpu.memory_space<vmem>>, vector<4x256xf32>
    tpu.vector_store %arg8[%c0_215, %c17_216], %261 {strides = array<i32>} : memref<4x290xf32, #tpu.memory_space<vmem>>, vector<4x256xf32>,
    %c0_217 = arith.constant 0 : index
    %c0_218 = arith.constant 0 : index
    %263 = vector.load %arg8[%c0_217, %c0_218] : memref<4x290xf32, #tpu.memory_space<vmem>>, vector<4x256xf32>
    %c0_219 = arith.constant 0 : index
    %c0_220 = arith.constant 0 : index
    %264 = vector.load %arg1[%c0_219, %c0_220] : memref<9x256xf32, #tpu.memory_space<vmem>>, vector<1x256xf32>
    %cst_221 = arith.constant 0.000000e+00 : f32
    %265 = vector.broadcast %cst_221 : f32 to vector<1x256xf32>
    %266 = arith.cmpf one, %264, %265 : vector<1x256xf32>
    %cst_222 = arith.constant 0.000000e+00 : f32
    %267 = vector.shape_cast %266 : vector<1x256xi1> to vector<1x256xi1>
    %268 = vector.broadcast %267 : vector<1x256xi1> to vector<4x256xi1>
    %269 = vector.broadcast %cst_222 : f32 to vector<4x256xf32>
    %270 = arith.select %268, %263, %269 : vector<4x256xi1>, vector<4x256xf32>
    %c0_223 = arith.constant 0 : index
    %c256_224 = arith.constant 256 : index
    %271 = vector.load %arg10[%c0_223, %c256_224] : memref<36x512xf32, #tpu.memory_space<vmem>>, vector<4x256xf32>
    tpu.vector_store %arg10[%c0_223, %c256_224], %270 {strides = array<i32>} : memref<36x512xf32, #tpu.memory_space<vmem>>, vector<4x256xf32>,
    %c0_225 = arith.constant 0 : index
    %c1_226 = arith.constant 1 : index
    %272 = vector.load %arg8[%c0_225, %c1_226] : memref<4x290xf32, #tpu.memory_space<vmem>>, vector<4x256xf32>
    %c1_227 = arith.constant 1 : index
    %c0_228 = arith.constant 0 : index
    %273 = vector.load %arg1[%c1_227, %c0_228] : memref<9x256xf32, #tpu.memory_space<vmem>>, vector<1x256xf32>
    %cst_229 = arith.constant 0.000000e+00 : f32
    %274 = vector.broadcast %cst_229 : f32 to vector<1x256xf32>
    %275 = arith.cmpf one, %273, %274 : vector<1x256xf32>
    %cst_230 = arith.constant 0.000000e+00 : f32
    %276 = vector.shape_cast %275 : vector<1x256xi1> to vector<1x256xi1>
    %277 = vector.broadcast %276 : vector<1x256xi1> to vector<4x256xi1>
    %278 = vector.broadcast %cst_230 : f32 to vector<4x256xf32>
    %279 = arith.select %277, %272, %278 : vector<4x256xi1>, vector<4x256xf32>
    %c4_231 = arith.constant 4 : index
    %c256_232 = arith.constant 256 : index
    %280 = vector.load %arg10[%c4_231, %c256_232] : memref<36x512xf32, #tpu.memory_space<vmem>>, vector<4x256xf32>
    tpu.vector_store %arg10[%c4_231, %c256_232], %279 {strides = array<i32>} : memref<36x512xf32, #tpu.memory_space<vmem>>, vector<4x256xf32>,
    %c0_233 = arith.constant 0 : index
    %c2_234 = arith.constant 2 : index
    %281 = vector.load %arg8[%c0_233, %c2_234] : memref<4x290xf32, #tpu.memory_space<vmem>>, vector<4x256xf32>
    %c2_235 = arith.constant 2 : index
    %c0_236 = arith.constant 0 : index
    %282 = vector.load %arg1[%c2_235, %c0_236] : memref<9x256xf32, #tpu.memory_space<vmem>>, vector<1x256xf32>
    %cst_237 = arith.constant 0.000000e+00 : f32
    %283 = vector.broadcast %cst_237 : f32 to vector<1x256xf32>
    %284 = arith.cmpf one, %282, %283 : vector<1x256xf32>
    %cst_238 = arith.constant 0.000000e+00 : f32
    %285 = vector.shape_cast %284 : vector<1x256xi1> to vector<1x256xi1>
    %286 = vector.broadcast %285 : vector<1x256xi1> to vector<4x256xi1>
    %287 = vector.broadcast %cst_238 : f32 to vector<4x256xf32>
    %288 = arith.select %286, %281, %287 : vector<4x256xi1>, vector<4x256xf32>
    %c8_239 = arith.constant 8 : index
    %c256_240 = arith.constant 256 : index
    %289 = vector.load %arg10[%c8_239, %c256_240] : memref<36x512xf32, #tpu.memory_space<vmem>>, vector<4x256xf32>
    tpu.vector_store %arg10[%c8_239, %c256_240], %288 {strides = array<i32>} : memref<36x512xf32, #tpu.memory_space<vmem>>, vector<4x256xf32>,
    %c0_241 = arith.constant 0 : index
    %c16_242 = arith.constant 16 : index
    %290 = vector.load %arg8[%c0_241, %c16_242] : memref<4x290xf32, #tpu.memory_space<vmem>>, vector<4x256xf32>
    %c3_243 = arith.constant 3 : index
    %c0_244 = arith.constant 0 : index
    %291 = vector.load %arg1[%c3_243, %c0_244] : memref<9x256xf32, #tpu.memory_space<vmem>>, vector<1x256xf32>
    %cst_245 = arith.constant 0.000000e+00 : f32
    %292 = vector.broadcast %cst_245 : f32 to vector<1x256xf32>
    %293 = arith.cmpf one, %291, %292 : vector<1x256xf32>
    %cst_246 = arith.constant 0.000000e+00 : f32
    %294 = vector.shape_cast %293 : vector<1x256xi1> to vector<1x256xi1>
    %295 = vector.broadcast %294 : vector<1x256xi1> to vector<4x256xi1>
    %296 = vector.broadcast %cst_246 : f32 to vector<4x256xf32>
    %297 = arith.select %295, %290, %296 : vector<4x256xi1>, vector<4x256xf32>
    %c12_247 = arith.constant 12 : index
    %c256_248 = arith.constant 256 : index
    %298 = vector.load %arg10[%c12_247, %c256_248] : memref<36x512xf32, #tpu.memory_space<vmem>>, vector<4x256xf32>
    tpu.vector_store %arg10[%c12_247, %c256_248], %297 {strides = array<i32>} : memref<36x512xf32, #tpu.memory_space<vmem>>, vector<4x256xf32>,
    %c0_249 = arith.constant 0 : index
    %c17_250 = arith.constant 17 : index
    %299 = vector.load %arg8[%c0_249, %c17_250] : memref<4x290xf32, #tpu.memory_space<vmem>>, vector<4x256xf32>
    %c4_251 = arith.constant 4 : index
    %c0_252 = arith.constant 0 : index
    %300 = vector.load %arg1[%c4_251, %c0_252] : memref<9x256xf32, #tpu.memory_space<vmem>>, vector<1x256xf32>
    %cst_253 = arith.constant 0.000000e+00 : f32
    %301 = vector.broadcast %cst_253 : f32 to vector<1x256xf32>
    %302 = arith.cmpf one, %300, %301 : vector<1x256xf32>
    %cst_254 = arith.constant 0.000000e+00 : f32
    %303 = vector.shape_cast %302 : vector<1x256xi1> to vector<1x256xi1>
    %304 = vector.broadcast %303 : vector<1x256xi1> to vector<4x256xi1>
    %305 = vector.broadcast %cst_254 : f32 to vector<4x256xf32>
    %306 = arith.select %304, %299, %305 : vector<4x256xi1>, vector<4x256xf32>
    %c16_255 = arith.constant 16 : index
    %c256_256 = arith.constant 256 : index
    %307 = vector.load %arg10[%c16_255, %c256_256] : memref<36x512xf32, #tpu.memory_space<vmem>>, vector<4x256xf32>
    tpu.vector_store %arg10[%c16_255, %c256_256], %306 {strides = array<i32>} : memref<36x512xf32, #tpu.memory_space<vmem>>, vector<4x256xf32>,
    %c0_257 = arith.constant 0 : index
    %c18_258 = arith.constant 18 : index
    %308 = vector.load %arg8[%c0_257, %c18_258] : memref<4x290xf32, #tpu.memory_space<vmem>>, vector<4x256xf32>
    %c5_259 = arith.constant 5 : index
    %c0_260 = arith.constant 0 : index
    %309 = vector.load %arg1[%c5_259, %c0_260] : memref<9x256xf32, #tpu.memory_space<vmem>>, vector<1x256xf32>
    %cst_261 = arith.constant 0.000000e+00 : f32
    %310 = vector.broadcast %cst_261 : f32 to vector<1x256xf32>
    %311 = arith.cmpf one, %309, %310 : vector<1x256xf32>
    %cst_262 = arith.constant 0.000000e+00 : f32
    %312 = vector.shape_cast %311 : vector<1x256xi1> to vector<1x256xi1>
    %313 = vector.broadcast %312 : vector<1x256xi1> to vector<4x256xi1>
    %314 = vector.broadcast %cst_262 : f32 to vector<4x256xf32>
    %315 = arith.select %313, %308, %314 : vector<4x256xi1>, vector<4x256xf32>
    %c20_263 = arith.constant 20 : index
    %c256_264 = arith.constant 256 : index
    %316 = vector.load %arg10[%c20_263, %c256_264] : memref<36x512xf32, #tpu.memory_space<vmem>>, vector<4x256xf32>
    tpu.vector_store %arg10[%c20_263, %c256_264], %315 {strides = array<i32>} : memref<36x512xf32, #tpu.memory_space<vmem>>, vector<4x256xf32>,
    %c0_265 = arith.constant 0 : index
    %c32_266 = arith.constant 32 : index
    %317 = vector.load %arg8[%c0_265, %c32_266] : memref<4x290xf32, #tpu.memory_space<vmem>>, vector<4x256xf32>
    %c6_267 = arith.constant 6 : index
    %c0_268 = arith.constant 0 : index
    %318 = vector.load %arg1[%c6_267, %c0_268] : memref<9x256xf32, #tpu.memory_space<vmem>>, vector<1x256xf32>
    %cst_269 = arith.constant 0.000000e+00 : f32
    %319 = vector.broadcast %cst_269 : f32 to vector<1x256xf32>
    %320 = arith.cmpf one, %318, %319 : vector<1x256xf32>
    %cst_270 = arith.constant 0.000000e+00 : f32
    %321 = vector.shape_cast %320 : vector<1x256xi1> to vector<1x256xi1>
    %322 = vector.broadcast %321 : vector<1x256xi1> to vector<4x256xi1>
    %323 = vector.broadcast %cst_270 : f32 to vector<4x256xf32>
    %324 = arith.select %322, %317, %323 : vector<4x256xi1>, vector<4x256xf32>
    %c24_271 = arith.constant 24 : index
    %c256_272 = arith.constant 256 : index
    %325 = vector.load %arg10[%c24_271, %c256_272] : memref<36x512xf32, #tpu.memory_space<vmem>>, vector<4x256xf32>
    tpu.vector_store %arg10[%c24_271, %c256_272], %324 {strides = array<i32>} : memref<36x512xf32, #tpu.memory_space<vmem>>, vector<4x256xf32>,
    %c0_273 = arith.constant 0 : index
    %c33_274 = arith.constant 33 : index
    %326 = vector.load %arg8[%c0_273, %c33_274] : memref<4x290xf32, #tpu.memory_space<vmem>>, vector<4x256xf32>
    %c7_275 = arith.constant 7 : index
    %c0_276 = arith.constant 0 : index
    %327 = vector.load %arg1[%c7_275, %c0_276] : memref<9x256xf32, #tpu.memory_space<vmem>>, vector<1x256xf32>
    %cst_277 = arith.constant 0.000000e+00 : f32
    %328 = vector.broadcast %cst_277 : f32 to vector<1x256xf32>
    %329 = arith.cmpf one, %327, %328 : vector<1x256xf32>
    %cst_278 = arith.constant 0.000000e+00 : f32
    %330 = vector.shape_cast %329 : vector<1x256xi1> to vector<1x256xi1>
    %331 = vector.broadcast %330 : vector<1x256xi1> to vector<4x256xi1>
    %332 = vector.broadcast %cst_278 : f32 to vector<4x256xf32>
    %333 = arith.select %331, %326, %332 : vector<4x256xi1>, vector<4x256xf32>
    %c28_279 = arith.constant 28 : index
    %c256_280 = arith.constant 256 : index
    %334 = vector.load %arg10[%c28_279, %c256_280] : memref<36x512xf32, #tpu.memory_space<vmem>>, vector<4x256xf32>
    tpu.vector_store %arg10[%c28_279, %c256_280], %333 {strides = array<i32>} : memref<36x512xf32, #tpu.memory_space<vmem>>, vector<4x256xf32>,
    %c0_281 = arith.constant 0 : index
    %c34_282 = arith.constant 34 : index
    %335 = vector.load %arg8[%c0_281, %c34_282] : memref<4x290xf32, #tpu.memory_space<vmem>>, vector<4x256xf32>
    %c8_283 = arith.constant 8 : index
    %c0_284 = arith.constant 0 : index
    %336 = vector.load %arg1[%c8_283, %c0_284] : memref<9x256xf32, #tpu.memory_space<vmem>>, vector<1x256xf32>
    %cst_285 = arith.constant 0.000000e+00 : f32
    %337 = vector.broadcast %cst_285 : f32 to vector<1x256xf32>
    %338 = arith.cmpf one, %336, %337 : vector<1x256xf32>
    %cst_286 = arith.constant 0.000000e+00 : f32
    %339 = vector.shape_cast %338 : vector<1x256xi1> to vector<1x256xi1>
    %340 = vector.broadcast %339 : vector<1x256xi1> to vector<4x256xi1>
    %341 = vector.broadcast %cst_286 : f32 to vector<4x256xf32>
    %342 = arith.select %340, %335, %341 : vector<4x256xi1>, vector<4x256xf32>
    %c32_287 = arith.constant 32 : index
    %c256_288 = arith.constant 256 : index
    %343 = vector.load %arg10[%c32_287, %c256_288] : memref<36x512xf32, #tpu.memory_space<vmem>>, vector<4x256xf32>
    tpu.vector_store %arg10[%c32_287, %c256_288], %342 {strides = array<i32>} : memref<36x512xf32, #tpu.memory_space<vmem>>, vector<4x256xf32>,
    %c0_289 = arith.constant 0 : index
    %c0_290 = arith.constant 0 : index
    %344 = vector.load %arg5[%c0_289, %c0_290] : memref<4x36xf32, #tpu.memory_space<vmem>>, vector<4x36xf32>
    %c0_291 = arith.constant 0 : index
    %c0_292 = arith.constant 0 : index
    %345 = vector.load %arg10[%c0_291, %c0_292] : memref<36x512xf32, #tpu.memory_space<vmem>>, vector<36x512xf32>
    %cst_293 = arith.constant dense<0.000000e+00> : vector<4x512xf32>
    %346 = tpu.matmul %344, %345, %cst_293 {dimension_numbers = #tpu.dot_dimension_numbers<[1], [0], [0], [1], [0, 0, 1, 1], [], []>} : vector<4x36xf32>, vector<36x512xf32>, vector<4x512xf32> -> vector<4x512xf32>
    %c0_294 = arith.constant 0 : index
    %c0_295 = arith.constant 0 : index
    %347 = vector.load %arg6[%c0_294, %c0_295] : memref<4x1xf32, #tpu.memory_space<vmem>>, vector<4x1xf32>
    %348 = vector.broadcast %347 : vector<4x1xf32> to vector<4x512xf32>
    %349 = arith.addf %346, %348 : vector<4x512xf32>
    %350 = vector.extract_strided_slice %349 {offsets = [0, 0], sizes = [4, 256], strides = [1, 1]} : vector<4x512xf32> to vector<4x256xf32>
    %351 = arith.addf %350, %0 : vector<4x256xf32>
    %c0_296 = arith.constant 0 : index
    %c0_297 = arith.constant 0 : index
    %352 = vector.load %arg7[%c0_296, %c0_297] : memref<8x256xf32, #tpu.memory_space<vmem>>, vector<4x256xf32>
    tpu.vector_store %arg7[%c0_296, %c0_297], %351 {strides = array<i32>} : memref<8x256xf32, #tpu.memory_space<vmem>>, vector<4x256xf32>,
    %353 = vector.extract_strided_slice %349 {offsets = [0, 256], sizes = [4, 256], strides = [1, 1]} : vector<4x512xf32> to vector<4x256xf32>
    %354 = arith.addf %353, %85 : vector<4x256xf32>
    %c4_298 = arith.constant 4 : index
    %c0_299 = arith.constant 0 : index
    %355 = vector.load %arg7[%c4_298, %c0_299] : memref<8x256xf32, #tpu.memory_space<vmem>>, vector<4x256xf32>
    tpu.vector_store %arg7[%c4_298, %c0_299], %354 {strides = array<i32>} : memref<8x256xf32, #tpu.memory_space<vmem>>, vector<4x256xf32>,
    return
  }
  func.func @transform_0(%arg0: i32) -> (i32, i32) {
    %c0_i32 = arith.constant 0 : i32
    %c0_i32_0 = arith.constant 0 : i32
    %c0_i32_1 = arith.constant 0 : i32
    return %c0_i32, %c0_i32_0 : i32, i32
  }
  func.func @transform_1(%arg0: i32) -> (i32, i32) {
    %c0_i32 = arith.constant 0 : i32
    %c0_i32_0 = arith.constant 0 : i32
    return %arg0, %c0_i32 : i32, i32
  }
  func.func @transform_2(%arg0: i32) -> (i32, i32) {
    %c0_i32 = arith.constant 0 : i32
    %c0_i32_0 = arith.constant 0 : i32
    %c0_i32_1 = arith.constant 0 : i32
    return %c0_i32, %c0_i32_0 : i32, i32
  }
  func.func @transform_3(%arg0: i32) -> (i32, i32) {
    %c0_i32 = arith.constant 0 : i32
    %c0_i32_0 = arith.constant 0 : i32
    %c0_i32_1 = arith.constant 0 : i32
    return %c0_i32, %c0_i32_0 : i32, i32
  }
  func.func @transform_4(%arg0: i32) -> (i32, i32) {
    %c0_i32 = arith.constant 0 : i32
    %c0_i32_0 = arith.constant 0 : i32
    %c0_i32_1 = arith.constant 0 : i32
    return %c0_i32, %c0_i32_0 : i32, i32
  }
  func.func @transform_5(%arg0: i32) -> (i32, i32) {
    %c0_i32 = arith.constant 0 : i32
    %c0_i32_0 = arith.constant 0 : i32
    %c0_i32_1 = arith.constant 0 : i32
    return %c0_i32, %c0_i32_0 : i32, i32
  }
  func.func @transform_6(%arg0: i32) -> (i32, i32) {
    %c0_i32 = arith.constant 0 : i32
    %c0_i32_0 = arith.constant 0 : i32
    return %arg0, %c0_i32 : i32, i32
  }
}

</mosaic_0001>

<bundles_post_ra>
// kernel: tpu_custom_call.1
= control target key start
LH: loop header
LB: loop body
LE: loop exit
PB: predicated region body
PF: predicated region fallthrough
CT: control target
= control target key end

     0   :  { %11 = vsyncpa [#allocation6], 0  ;;  %s2460_s0 = inlined_call_operand.hbm [shape: f32[9,256], index: 0, kind: input, shape index: {}]   ;;  %s2461_s1 = inlined_call_operand.hbm [shape: f32[8,256], index: 1, kind: input, shape index: {}]   ;;  %s2462_s2 = inlined_call_operand.vmem [shape: f32[4,36], index: 2, kind: input, shape index: {}]   ;;  %s2463_s3 = inlined_call_operand.vmem [shape: f32[4,1], index: 3, kind: input, shape index: {}]   ;;  %s2464_s4 = inlined_call_operand.vmem [shape: f32[4,36], index: 4, kind: input, shape index: {}]   ;;  %s2465_s5 = inlined_call_operand.vmem [shape: f32[4,1], index: 5, kind: input, shape index: {}]   ;;  %s2466_s6 = inlined_call_operand.hbm [shape: f32[8,256], index: 6, kind: output, shape index: {}]  }
   0x1   :  { %12 = vsyncpa [#allocation9], 0 }
   0x2   :  { %13 = vsyncpa [#allocation7], 0  ;;  %s1840_s21 = smov [#allocation5]  }
   0x3   :  { %s19_s22 = sshll.u32 %s1840_s21, 4  ;;  %s20_s22 = int_to_ptr.vmem [resolvable:$true] %s19_s22 }
   0x4   :  { %s1782_s23 = scalar_lea.vmem %s20_s22, 512  ;;  %p1787_p1 = scmp.lt.s32.totalorder %s20_s22, %s20_s22 }
   0x5   :  { %p1783_p0 = scmp.ne.s32.totalorder %s20_s22, %s1782_s23  ;;  %p1788_p2 = scmp.lt.s32.totalorder %s1782_s23, %s1782_s23 }
   0x7   :  { %p1789_p3 = por %p1788_p2, %p1787_p1 }
   0x9   :  { %p1790_p4 = pnand %p1789_p3, %p1783_p0 }
   0xb   :  { %1793 = shalt.err (!%p1790_p4)
}
   0xc   :  { %s1841_s24 = smov 256   ;;  %s1842_s25 = smov 16  }
   0xd   :  { %25 = dma.hbm_to_vmem [thread:$0]  %s2460_s0, 512, %s20_s22, [#allocation6], %s1841_s24, %s1841_s24, %s1842_s25  }
   0xe   :  { %s1843_s28 = smov [#allocation8]  }
   0xf   :  { %s32_s29 = sshll.u32 %s1843_s28, 4  ;;  %s33_s29 = int_to_ptr.vmem [resolvable:$true] %s32_s29 }
  0x10   :  { %s1802_s30 = scalar_lea.vmem %s33_s29, 256  ;;  %p1807_p6 = scmp.lt.s32.totalorder %s33_s29, %s33_s29 }
  0x11   :  { %p1803_p5 = scmp.ne.s32.totalorder %s33_s29, %s1802_s30  ;;  %p1808_p7 = scmp.lt.s32.totalorder %s1802_s30, %s1802_s30 }
  0x13   :  { %p1809_p8 = por %p1808_p7, %p1807_p6 }
  0x15   :  { %p1810_p9 = pnand %p1809_p8, %p1803_p5 }
  0x17   :  { %1813 = shalt.err (!%p1810_p9)
}
  0x18   :  { %35 = dma.hbm_to_vmem [thread:$0]  %s2461_s1, 256, %s33_s29, [#allocation9]  }
  0x19   :  { %1834 = dma.done.wait [#allocation6], 512  }
  0x1a   :  { %1835 = vsyncadd [#allocation6], 4294966784 }
  0x1b   :  { %1836 = dma.done.wait [#allocation9], 256  }
  0x1c   :  { %1837 = vsyncadd [#allocation9], 4294967040  ;;  %v50_v0 = vld [vmem:[#allocation8] sm:$0xf]  ;;  %v51_v1 = vld [vmem:[#allocation8 + $0x8] sm:$0xf]  ;;  %v74_v11 = vlaneseq }
  0x1d   :  { %v387_v2 = vld [vmem:[#allocation8] sm:$0xf0]  ;;  %v52_v3 = vmax.f32 %v50_v0, 0.0  ;;  %v53_v4 = vmax.f32 %v51_v1, 0.0  ;;  %v388_v5 = vld [vmem:[#allocation8 + $0x8] sm:$0xf0] }
  0x1e   :  { %v389_v6 = vmax.f32 %v387_v2, 0.0  ;;  %v390_v7 = vmax.f32 %v388_v5, 0.0  ;;  %v1844_v9 = vmov 0   ;;  %s1845_s0 = smov 17   ;;  %v75_v13 = vshrl.u32 %v74_v11, 7  ;;  %s1846_s1 = smov 95  }
  0x1f   :  { %v56_v8 = vcombine.low %v52_v3, %v53_v4  ;;  %1765 = vset.pattern.permute.xlu0 %v1844_v9  ;;  %v71_v12 = vld [vmem:[#allocation5] ss:$8 sm:$0x3]  ;;  %vm64_vm0 = vcmask 1043592   ;;  %vm65_vm1 = vcmask 1047556   ;;  %vm60_vm3 = vcmask 138240  }
  0x20   :  { %v393_v10 = vcombine.high %v389_v6, %v390_v7  ;;  %vm72_vm2 = vcmp.ne.f32.partialorder %v71_v12, 0.0  ;;  %vm2467_vm4 = vcmask 134144   ;;  %vm1900_vm5 = vmor %vm65_vm1, %vm64_vm0  ;;  %v1904_v17 = vsub.s32 0, %v75_v13  ;;  %v403_v24 = vld [vmem:[#allocation5] ss:$8 sm:$0x3] }
  0x21   :  { %57 = vrot.lane.b32.xlu0 %v56_v8, %s1845_s0  ;;  %v73_v18 = vsel %vm72_vm2, 1, %v1844_v9  ;;  %v1909_v20 = vsub.s32 1, %v75_v13  ;;  %vm404_vm7 = vcmp.ne.f32.partialorder %v403_v24, 0.0  ;;  %s1847_s9 = smov 94   ;;  %s1848_s10 = smov 110   ;;  %v1854_v49 = vmov 0.0  }
  0x22   :  { %v77_v23 = vrot.slane %v73_v18, %v1904_v17  ;;  %v405_v39 = vsel %vm404_vm7, 1, %v1844_v9  ;;  %s1849_s11 = smov 112   ;;  %s1850_s12 = smov 96   ;;  %811 = vmatprep.mubr.f32.mxu0 %v1854_v49  ;;  %882 = vmatprep.mubr.f32.mxu1 %v1854_v49  ;;  %v724_v56 = vld [vmem:[%s2463_s3] sm:$0xf]  ;;  %vm378_vm14 = vcmask 769024  }
  0x23   :  { %v81_v25 = vrot.slane %v73_v18, %v1909_v20  ;;  %v413_v41 = vrot.slane %v405_v39, %v1909_v20  ;;  %v409_v42 = vrot.slane %v405_v39, %v1904_v17  ;;  %s1851_s13 = smov 127   ;;  %s1852_s14 = smov 111   ;;  %v356_v59 = vld [vmem:[#allocation5 + $0x10] ss:$8 sm:$0x3]  ;;  %vm264_vm1 = vcmask 900096  }
  0x24   :  { %vm1916_vm6 = vcmp.eq.s32.totalorder %v77_v23, 1  ;;  %s1853_s15 = smov 126   ;;  %vm357_vm11 = vcmp.ne.f32.partialorder %v356_v59, 0.0  ;;  %v242_v62 = vld [vmem:[#allocation5 + $0x5] ss:$8 sm:$0x3] }
  0x25   :  { %394 = vrot.lane.b32.xlu0 %v393_v10, %s1845_s0  ;;  %vm83_vm8 = vcmp.eq.s32.totalorder %v81_v25, 1  ;;  %vm415_vm9 = vcmp.eq.s32.totalorder %v413_v41, 1  ;;  %vm414_vm10 = vcmp.eq.s32.totalorder %v409_v42, 1  ;;  %v358_v1 = vsel %vm357_vm11, 1, %v1844_v9 }
  0x26   :  { %vm243_vm12 = vcmp.ne.f32.partialorder %v242_v62, 0.0  ;;  %v282_v2 = vld [vmem:[#allocation5 + $0x6] ss:$8 sm:$0x3]  ;;  %v366_v4 = vrot.slane %v358_v1, %v1909_v20  ;;  %vm190_vm11 = vcmask 916480  }
  0x27   :  { %v244_v6 = vsel %vm243_vm12, 1, %v1844_v9  ;;  %vm283_vm13 = vcmp.ne.f32.partialorder %v282_v2, 0.0  ;;  %v168_v7 = vld [vmem:[#allocation5 + $0x3] ss:$8 sm:$0x3] }
  0x28   :  { %vm368_vm15 = vcmp.eq.s32.totalorder %v366_v4, 1  ;;  %v248_v10 = vrot.slane %v244_v6, %v1904_v17  ;;  %v252_v11 = vrot.slane %v244_v6, %v1909_v20  ;;  %v2009_v13 = vsel %vm283_vm13, 1, %v1844_v9  ;;  %v134_v41 = vld [vmem:[#allocation5 + $0x2] ss:$8 sm:$0x3] }
  0x29   :  { %vm169_vm0 = vcmp.ne.f32.partialorder %v168_v7, 0.0  ;;  %v316_v2 = vld [vmem:[#allocation5 + $0x7] ss:$8 sm:$0x3] }
  0x2a   :  { %vm253_vm2 = vcmp.eq.s32.totalorder %v248_v10, 1 }
  0x93   :  { %v58_v14 = vpop.permute.xlu0 %57 }
  0x94   :  { %v59_v16 = vrot.slane %v58_v14, 4 }
  0x96   :  { %v61_v19 = vsel %vm60_vm3, %v59_v16, %v58_v14  ;;  %69 = vst.msk [vmem:[#allocation2 + $0x8] sm:$0xf] %vm2467_vm4, %v59_v16  ;;  %v208_v16 = vld [vmem:[#allocation5 + $0x4] ss:$8 sm:$0x3] }
  0x97   :  { %67 = vst.msk [vmem:[#allocation2] sm:$0xff] %vm1900_vm5, %v61_v19  ;;  %v395_v21 = vpop.permute.xlu0 %394  ;;  %vm209_vm7 = vcmp.ne.f32.partialorder %v208_v16, 0.0 }
  0x98   :  { %v396_v22 = vrot.slane %v395_v21, 4 }
  0x9a   :  { %v397_v26 = vsel %vm60_vm3, %v396_v22, %v395_v21  ;;  %v292_v21 = vrot.slane %v2009_v13, %v1909_v20 }
  0x9d   :  { %v314_v28 = vld [vmem:[#allocation2 + $0x8] sm:$0xf] }
  0x9e   :  { %v354_v29 = vld [vmem:[#allocation2 + $0x8] sm:$0xf]  ;;  %v70_v31 = vld [vmem:[#allocation2] sm:$0xff]  ;;  %336 = vrot.lane.b32.xlu1 %v314_v28, %s1846_s1 }
  0x9f   :  { %v240_v30 = vld [vmem:[#allocation2 + $0x8] sm:$0xf]  ;;  %332 = vrot.lane.b32.xlu0 %v70_v31, %s1846_s1  ;;  %v371_v34 = vcombine.high %v70_v31, %v70_v31  ;;  %400 = vst.msk [vmem:[#allocation2] sm:$0xff] %vm1900_vm5, %v397_v26  ;;  %v87_v38 = vsel %vm1916_vm6, %v70_v31, 0.0  ;;  %vm254_vm6 = vcmp.eq.s32.totalorder %v252_v11, 1 }
  0xa0   :  { %v280_v32 = vld [vmem:[#allocation2 + $0x8] sm:$0xf]  ;;  %89 = vst [vmem:[#allocation3] sm:$0xf] %v87_v38 }
  0xa1   :  { %v166_v33 = vld [vmem:[#allocation2 + $0x8] sm:$0xf]  ;;  %v88_v40 = vsel %vm83_vm8, %v371_v34, 0.0  ;;  %vm304_vm8 = vcmask 785408  }
  0xa2   :  { %v206_v35 = vld [vmem:[#allocation2 + $0x8] sm:$0xf]  ;;  %376 = vrot.lane.b32.xlu1 %v354_v29, %s1847_s9  ;;  %90 = vst [vmem:[#allocation3 + $0x68] sm:$0xf] %v88_v40 }
  0xa3   :  { %v92_v36 = vld [vmem:[#allocation2 + $0x8] sm:$0xf]  ;;  %258 = vrot.lane.b32.xlu0 %v70_v31, %s1848_s10 }
  0xa4   :  { %v132_v37 = vld [vmem:[#allocation2 + $0x8] sm:$0xf] }
  0xa5   :  { %401 = vst.msk [vmem:[#allocation2 + $0x8] sm:$0xf] %vm2467_vm4, %v396_v22  ;;  %v170_v22 = vsel %vm169_vm0, 1, %v1844_v9 }
  0xa6   :  { %262 = vrot.lane.b32.xlu1 %v240_v30, %s1848_s10  ;;  %v1934_v43 = vld [vmem:[#allocation2] sm:$0xff]  ;;  %v174_v28 = vrot.slane %v170_v22, %v1904_v17  ;;  %v178_v29 = vrot.slane %v170_v22, %v1909_v20  ;;  %v94_v30 = vld [vmem:[#allocation5 + $0x1] ss:$8 sm:$0x3] }
  0xa7   :  { %184 = vrot.lane.b32.xlu0 %v70_v31, %s1849_s11  ;;  %v650_v44 = vcombine.high %v1934_v43, %v1934_v43  ;;  %v419_v46 = vsel %vm414_vm10, %v1934_v43, 0.0  ;;  %vm734_vm10 = vcmask 1043456   ;;  %vm95_vm12 = vcmp.ne.f32.partialorder %v94_v30, 0.0 }
  0xa8   :  { %421 = vst [vmem:[#allocation3 + $0x48] sm:$0xf] %v419_v46  ;;  %vm179_vm13 = vcmp.eq.s32.totalorder %v174_v28, 1 }
  0xa9   :  { %v420_v45 = vsel %vm415_vm9, %v650_v44, 0.0  ;;  %vm294_vm9 = vcmp.eq.s32.totalorder %v292_v21, 1 }
  0xaa   :  { %302 = vrot.lane.b32.xlu1 %v280_v32, %s1850_s12  ;;  %422 = vst [vmem:[#allocation3 + $0x80] sm:$0xf] %v420_v45  ;;  %v96_v45 = vsel %vm95_vm12, 1, %v1844_v9  ;;  %vm116_vm12 = vcmask 1039360  }
  0xab   :  { %110 = vrot.lane.b32.xlu0 %v70_v31, %s1851_s13  ;;  %v104_v59 = vrot.slane %v96_v45, %v1909_v20 }
  0xac   :  { %v634_v47 = vld [vmem:[#allocation2 + $0x8] sm:$0xf] }
  0xad   :  { %v672_v48 = vld [vmem:[#allocation2 + $0x8] sm:$0xf] }
  0xae   :  { %188 = vrot.lane.b32.xlu1 %v166_v33, %s1849_s11  ;;  %v564_v50 = vld [vmem:[#allocation2 + $0x8] sm:$0xf] }
  0xaf   :  { %374 = vrot.lane.b32.xlu0 %v371_v34, %s1847_s9  ;;  %v602_v51 = vld [vmem:[#allocation2 + $0x8] sm:$0xf] }
  0xb0   :  { %v494_v52 = vld [vmem:[#allocation2 + $0x8] sm:$0xf] }
  0xb1   :  { %v532_v53 = vld [vmem:[#allocation2 + $0x8] sm:$0xf] }
  0xb2   :  { %228 = vrot.lane.b32.xlu1 %v206_v35, %s1852_s14  ;;  %v424_v54 = vld [vmem:[#allocation2 + $0x8] sm:$0xf] }
  0xb3   :  { %260 = vrot.lane.b32.xlu0 %v371_v34, %s1848_s10  ;;  %v462_v55 = vld [vmem:[#allocation2 + $0x8] sm:$0xf] }
  0xb6   :  { %114 = vrot.lane.b32.xlu1 %v92_v36, %s1851_s13  ;;  %v362_v36 = vrot.slane %v358_v1, %v1904_v17 }
  0xb7   :  { %300 = vrot.lane.b32.xlu0 %v371_v34, %s1850_s12 }
  0xb8   :  { %vm2024_vm0 = vcmp.eq.s32.totalorder %v362_v36, 1  ;;  %v673_v36 = vld [vmem:[#allocation5 + $0x10] ss:$8 sm:$0x3] }
  0xba   :  { %154 = vrot.lane.b32.xlu1 %v132_v37, %s1853_s15 }
  0xbb   :  { %186 = vrot.lane.b32.xlu0 %v371_v34, %s1849_s11 }
  0xbe   :  { %372 = vrot.lane.b32.xlu1 %v70_v31, %s1847_s9 }
  0xbf   :  { %226 = vrot.lane.b32.xlu0 %v371_v34, %s1852_s14 }
  0xc2   :  { %298 = vrot.lane.b32.xlu1 %v70_v31, %s1850_s12 }
  0xc3   :  { %112 = vrot.lane.b32.xlu0 %v371_v34, %s1851_s13 }
  0xc6   :  { %224 = vrot.lane.b32.xlu1 %v70_v31, %s1852_s14 }
  0xc7   :  { %152 = vrot.lane.b32.xlu0 %v371_v34, %s1853_s15 }
  0xca   :  { %150 = vrot.lane.b32.xlu1 %v70_v31, %s1853_s15 }
  0xcb   :  { %651 = vrot.lane.b32.xlu0 %v1934_v43, %s1846_s1 }
  0xce   :  { %334 = vrot.lane.b32.xlu1 %v371_v34, %s1846_s1  ;;  %v210_v34 = vsel %vm209_vm7, 1, %v1844_v9 }
  0xcf   :  { %581 = vrot.lane.b32.xlu0 %v1934_v43, %s1848_s10  ;;  %v218_v40 = vrot.slane %v210_v34, %v1909_v20  ;;  %v214_v1 = vrot.slane %v210_v34, %v1904_v17 }
  0xd1   :  { %vm2032_vm7 = vcmp.eq.s32.totalorder %v218_v40, 1 }
  0xd2   :  { %655 = vrot.lane.b32.xlu1 %v634_v47, %s1846_s1 }
  0xd3   :  { %511 = vrot.lane.b32.xlu0 %v1934_v43, %s1849_s11 }
  0xd6   :  { %693 = vrot.lane.b32.xlu1 %v672_v48, %s1847_s9 }
  0xd7   :  { %653 = vrot.lane.b32.xlu0 %v650_v44, %s1846_s1 }
  0xda   :  { %585 = vrot.lane.b32.xlu1 %v564_v50, %s1848_s10 }
  0xdb   :  { %691 = vrot.lane.b32.xlu0 %v650_v44, %s1847_s9 }
  0xde   :  { %623 = vrot.lane.b32.xlu1 %v602_v51, %s1850_s12 }
  0xdf   :  { %583 = vrot.lane.b32.xlu0 %v650_v44, %s1848_s10 }
  0xe2   :  { %515 = vrot.lane.b32.xlu1 %v494_v52, %s1849_s11  ;;  %v288_v52 = vrot.slane %v2009_v13, %v1904_v17 }
  0xe3   :  { %621 = vrot.lane.b32.xlu0 %v650_v44, %s1850_s12 }
  0xe6   :  { %553 = vrot.lane.b32.xlu1 %v532_v53, %s1852_s14 }
  0xe7   :  { %513 = vrot.lane.b32.xlu0 %v650_v44, %s1849_s11 }
  0xea   :  { %445 = vrot.lane.b32.xlu1 %v424_v54, %s1851_s13 }
  0xeb   :  { %551 = vrot.lane.b32.xlu0 %v650_v44, %s1852_s14 }
  0xee   :  { %483 = vrot.lane.b32.xlu1 %v462_v55, %s1853_s15 }
  0xef   :  { %443 = vrot.lane.b32.xlu0 %v650_v44, %s1851_s13 }
  0xf2   :  { %689 = vrot.lane.b32.xlu1 %v1934_v43, %s1847_s9 }
  0xf3   :  { %481 = vrot.lane.b32.xlu0 %v650_v44, %s1853_s15 }
  0xf6   :  { %619 = vrot.lane.b32.xlu1 %v1934_v43, %s1850_s12 }
  0xf7   :  { %441 = vrot.lane.b32.xlu0 %v1934_v43, %s1851_s13 }
  0xfa   :  { %549 = vrot.lane.b32.xlu1 %v1934_v43, %s1852_s14 }
  0xfb   :  { %727 = vperm.xlu0 %1765, %v724_v56   ;;  %v100_v56 = vrot.slane %v96_v45, %v1904_v17 }
  0xfe   :  { %479 = vrot.lane.b32.xlu1 %v1934_v43, %s1853_s15 }
 0x110   :  { %v1995_v57 = vpop.permute.xlu1 %336 }
 0x111   :  { %v1997_v58 = vpop.permute.xlu0 %332 }
 0x114   :  { %v377_v60 = vpop.permute.xlu1 %376 }
 0x115   :  { %v259_v61 = vpop.permute.xlu0 %258 }
 0x118   :  { %v263_v63 = vpop.permute.xlu1 %262 }
 0x119   :  { %v1999_v0 = vpop.permute.xlu0 %184 }
 0x11c   :  { %v303_v3 = vpop.permute.xlu1 %302 }
 0x11d   :  { %v2003_v5 = vpop.permute.xlu0 %110 }
 0x120   :  { %v189_v8 = vpop.permute.xlu1 %188 }
 0x121   :  { %v375_v12 = vpop.permute.xlu0 %374 }
 0x122   :  { %v380_v14 = vsel %vm378_vm14, %v375_v12, %v377_v60 }
 0x123   :  { %v384_v18 = vsel %vm368_vm15, %v380_v14, 0.0  ;;  %vm180_vm15 = vcmp.eq.s32.totalorder %v178_v29, 1 }
 0x124   :  { %386 = vst [vmem:[#allocation3 + $0x78] sm:$0xf] %v384_v18  ;;  %v229_v19 = vpop.permute.xlu1 %228 }
 0x125   :  { %v261_v23 = vpop.permute.xlu0 %260 }
 0x126   :  { %v265_v24 = vsel %vm264_vm1, %v259_v61, %v261_v23  ;;  %v266_v25 = vsel %vm264_vm1, %v261_v23, %v263_v63 }
 0x127   :  { %v269_v26 = vsel %vm253_vm2, %v265_v24, 0.0  ;;  %v270_v27 = vsel %vm254_vm6, %v266_v25, 0.0  ;;  %vm230_vm2 = vcmask 908288   ;;  %vm135_vm6 = vcmp.ne.f32.partialorder %v134_v41, 0.0 }
 0x128   :  { %v273_v31 = vrot.slane %v269_v26, 4  ;;  %v274_v32 = vrot.slane %v270_v27, 4  ;;  %v115_v33 = vpop.permute.xlu1 %114  ;;  %v136_v62 = vsel %vm135_vm6, 1, %v1844_v9  ;;  %vm2053_vm6 = vcmp.eq.s32.totalorder %v214_v1, 1 }
 0x129   :  { %v301_v35 = vpop.permute.xlu0 %300  ;;  %v144_v6 = vrot.slane %v136_v62, %v1909_v20  ;;  %v140_v18 = vrot.slane %v136_v62, %v1904_v17  ;;  %v495_v1 = vld [vmem:[#allocation5 + $0x3] ss:$8 sm:$0x3] }
 0x12a   :  { %277 = vst [vmem:[#allocation3 + $0x60] sm:$0xf0] %v273_v31  ;;  %278 = vst [vmem:[#allocation3 + $0x38] sm:$0xf0] %v274_v32  ;;  %v306_v37 = vsel %vm304_vm8, %v301_v35, %v303_v3 }
 0x12b   :  { %v310_v38 = vsel %vm294_vm9, %v306_v37, 0.0  ;;  %v720_v39 = vld [vmem:[#allocation3 + $0x78] sm:$0xf]  ;;  %vm293_vm9 = vcmp.eq.s32.totalorder %v288_v52, 1  ;;  %vm2058_vm4 = vcmp.eq.s32.totalorder %v144_v6, 1 }
 0x12c   :  { %312 = vst [vmem:[#allocation3 + $0x70] sm:$0xf] %v310_v38  ;;  %v155_v42 = vpop.permute.xlu1 %154  ;;  %1737 = vmatprep.subr.msk.mxu0 %vm734_vm10, %v720_v39  ;;  %v635_v32 = vld [vmem:[#allocation5 + $0x7] ss:$8 sm:$0x3] }
 0x12d   :  { %v187_v43 = vpop.permute.xlu0 %186 }
 0x12e   :  { %v191_v46 = vsel %vm190_vm11, %v1999_v0, %v187_v43  ;;  %v192_v47 = vsel %vm190_vm11, %v187_v43, %v189_v8 }
 0x12f   :  { %v195_v48 = vsel %vm179_vm13, %v191_v46, 0.0  ;;  %v196_v50 = vsel %vm180_vm15, %v192_v47, 0.0  ;;  %vm105_vm13 = vcmp.eq.s32.totalorder %v100_v56, 1  ;;  %vm106_vm15 = vcmp.eq.s32.totalorder %v104_v59, 1 }
 0x130   :  { %v199_v53 = vrot.slane %v195_v48, 4  ;;  %v200_v54 = vrot.slane %v196_v50, 4  ;;  %v373_v55 = vpop.permute.xlu1 %372  ;;  %v565_v48 = vld [vmem:[#allocation5 + $0x5] ss:$8 sm:$0x3] }
 0x131   :  { %v379_v60 = vsel %vm378_vm14, %v373_v55, %v375_v12  ;;  %v227_v61 = vpop.permute.xlu0 %226 }
 0x132   :  { %203 = vst [vmem:[#allocation3 + $0x10] sm:$0xf0] %v199_v53  ;;  %204 = vst [vmem:[#allocation3 + $0x28] sm:$0xf0] %v200_v54  ;;  %v383_v63 = vsel %vm2024_vm0, %v379_v60, 0.0  ;;  %v232_v0 = vsel %vm230_vm2, %v227_v61, %v229_v19  ;;  %vm317_vm0 = vcmp.ne.f32.partialorder %v316_v2, 0.0 }
 0x133   :  { %385 = vst [vmem:[#allocation3 + $0x8] sm:$0xf] %v383_v63  ;;  %v236_v3 = vsel %vm2032_vm7, %v232_v0, 0.0  ;;  %vm156_vm7 = vcmask 1031168  }
 0x134   :  { %238 = vst [vmem:[#allocation3 + $0x38] sm:$0xf] %v236_v3  ;;  %v299_v4 = vpop.permute.xlu1 %298 }
 0x135   :  { %v305_v7 = vsel %vm304_vm8, %v299_v4, %v301_v35  ;;  %v113_v8 = vpop.permute.xlu0 %112 }
 0x136   :  { %v309_v10 = vsel %vm293_vm9, %v305_v7, 0.0  ;;  %v117_v11 = vsel %vm116_vm12, %v2003_v5, %v113_v8  ;;  %v118_v12 = vsel %vm116_vm12, %v113_v8, %v115_v33  ;;  %v318_v5 = vsel %vm317_vm0, 1, %v1844_v9 }
 0x137   :  { %311 = vst [vmem:[#allocation3 + $0x58] sm:$0xf] %v309_v10  ;;  %v121_v14 = vsel %vm105_vm13, %v117_v11, 0.0  ;;  %v122_v16 = vsel %vm106_vm15, %v118_v12, 0.0  ;;  %vm145_vm9 = vcmp.eq.s32.totalorder %v140_v18, 1  ;;  %v322_v30 = vrot.slane %v318_v5, %v1904_v17 }
 0x138   :  { %v125_v19 = vrot.slane %v121_v14, 4  ;;  %v126_v21 = vrot.slane %v122_v16, 4  ;;  %v225_v22 = vpop.permute.xlu1 %224  ;;  %v326_v31 = vrot.slane %v318_v5, %v1909_v20  ;;  %vm2468_vm13 = vcmask 777216  }
 0x139   :  { %v231_v24 = vsel %vm230_vm2, %v225_v22, %v227_v61  ;;  %v153_v25 = vpop.permute.xlu0 %152  ;;  %vm636_vm15 = vcmp.ne.f32.partialorder %v635_v32, 0.0  ;;  %vm327_vm0 = vcmp.eq.s32.totalorder %v322_v30, 1  ;;  %v2121_v30 = vld [vmem:[%s2462_s2] sm:$0xf] }
 0x13a   :  { %129 = vst [vmem:[#allocation3] sm:$0xf0] %v125_v19  ;;  %130 = vst [vmem:[#allocation3 + $0x68] sm:$0xf0] %v126_v21  ;;  %v235_v26 = vsel %vm2053_vm6, %v231_v24, 0.0  ;;  %v158_v27 = vsel %vm156_vm7, %v153_v25, %v155_v42  ;;  %vm674_vm6 = vcmp.ne.f32.partialorder %v673_v36, 0.0 }
 0x13b   :  { %v719_v28 = vld [vmem:[#allocation3 + $0x8] sm:$0xf]  ;;  %237 = vst [vmem:[#allocation3 + $0x60] sm:$0xf] %v235_v26  ;;  %v162_v29 = vsel %vm2058_vm4, %v158_v27, 0.0  ;;  %vm328_vm4 = vcmp.eq.s32.totalorder %v326_v31, 1 }
 0x13c   :  { %1738 = vmatpush1.msk.msra.mxu0 %vm734_vm10, %v719_v28  ;;  %164 = vst [vmem:[#allocation3 + $0x28] sm:$0xf] %v162_v29  ;;  %v151_v33 = vpop.permute.xlu1 %150  ;;  %v637_v42 = vsel %vm636_vm15, 1, %v1844_v9  ;;  %v2079_v47 = vsel %vm674_vm6, 1, %v1844_v9  ;;  %v712_v13 = vld [vmem:[#allocation3 + $0x38] sm:$0xff] }
 0x13d   :  { %v157_v34 = vsel %vm156_vm7, %v151_v33, %v153_v25  ;;  %v652_v35 = vpop.permute.xlu0 %651  ;;  %v641_v51 = vrot.slane %v637_v42, %v1904_v17  ;;  %v645_v52 = vrot.slane %v637_v42, %v1909_v20  ;;  %v683_v53 = vrot.slane %v2079_v47, %v1909_v20  ;;  %v533_v19 = vld [vmem:[#allocation5 + $0x4] ss:$8 sm:$0x3] }
 0x13e   :  { %v161_v37 = vsel %vm145_vm9, %v157_v34, 0.0  ;;  %vm566_vm9 = vcmp.ne.f32.partialorder %v565_v48, 0.0 }
 0x13f   :  { %163 = vst [vmem:[#allocation3 + $0x10] sm:$0xf] %v161_v37  ;;  %vm646_vm15 = vcmp.eq.s32.totalorder %v641_v51, 1  ;;  %v567_v56 = vsel %vm566_vm9, 1, %v1844_v9  ;;  %vm2090_vm6 = vcmp.eq.s32.totalorder %v683_v53, 1  ;;  %vm496_vm9 = vcmp.ne.f32.partialorder %v495_v1, 0.0 }
 0x140   :  { %v335_v38 = vpop.permute.xlu1 %334  ;;  %v571_v8 = vrot.slane %v567_v56, %v1904_v17  ;;  %v575_v10 = vrot.slane %v567_v56, %v1909_v20  ;;  %v497_v26 = vsel %vm496_vm9, 1, %v1844_v9 }
 0x141   :  { %v339_v39 = vsel %vm2468_vm13, %v1997_v58, %v335_v38  ;;  %v340_v40 = vsel %vm2468_vm13, %v335_v38, %v1995_v57  ;;  %v582_v41 = vpop.permute.xlu0 %581  ;;  %v603_v57 = vld [vmem:[#allocation5 + $0x6] ss:$8 sm:$0x3] }
 0x142   :  { %v343_v43 = vsel %vm327_vm0, %v339_v39, 0.0  ;;  %v344_v44 = vsel %vm328_vm4, %v340_v40, 0.0  ;;  %vm647_vm0 = vcmp.eq.s32.totalorder %v645_v52, 1  ;;  %vm604_vm4 = vcmp.ne.f32.partialorder %v603_v57, 0.0  ;;  %v711_v18 = vld [vmem:[#allocation3 + $0x60] sm:$0xff]  ;;  %v704_v29 = vld [vmem:[#allocation3 + $0x68] sm:$0xff] }
 0x143   :  { %v347_v45 = vrot.slane %v343_v43, 4  ;;  %v348_v46 = vrot.slane %v344_v44, 4  ;;  %v2095_v0 = vsel %vm604_vm4, 1, %v1844_v9  ;;  %v708_v22 = vld [vmem:[#allocation3 + $0x28] sm:$0xff]  ;;  %vm730_vm4 = vcmask 293888   ;;  %v703_v34 = vld [vmem:[#allocation3] sm:$0xff] }
 0x144   :  { %v656_v50 = vpop.permute.xlu1 %655  ;;  %v613_v14 = vrot.slane %v2095_v0, %v1909_v20  ;;  %v501_v39 = vrot.slane %v497_v26, %v1904_v17  ;;  %v505_v40 = vrot.slane %v497_v26, %v1909_v20 }
 0x145   :  { %351 = vst [vmem:[#allocation3 + $0x58] sm:$0xf0] %v347_v45  ;;  %352 = vst [vmem:[#allocation3 + $0x70] sm:$0xf0] %v348_v46  ;;  %v2083_v58 = vpop.permute.xlu0 %511 }
 0x146   :  { %v707_v25 = vld [vmem:[#allocation3 + $0x10] sm:$0xff]  ;;  %v463_v46 = vld [vmem:[#allocation5 + $0x2] ss:$8 sm:$0x3] }
 0x148   :  { %v694_v54 = vpop.permute.xlu1 %693 }
 0x149   :  { %v654_v55 = vpop.permute.xlu0 %653 }
 0x14a   :  { %v657_v59 = vsel %vm2468_vm13, %v652_v35, %v654_v55  ;;  %v658_v60 = vsel %vm2468_vm13, %v654_v55, %v656_v50  ;;  %vm534_vm13 = vcmp.ne.f32.partialorder %v533_v19, 0.0  ;;  %v425_v35 = vld [vmem:[#allocation5 + $0x1] ss:$8 sm:$0x3] }
 0x14b   :  { %v661_v62 = vsel %vm646_vm15, %v657_v59, 0.0  ;;  %v662_v63 = vsel %vm647_vm0, %v658_v60, 0.0  ;;  %vm2107_vm15 = vcmp.eq.s32.totalorder %v571_v8, 1  ;;  %vm2111_vm0 = vcmp.eq.s32.totalorder %v575_v10, 1 }
 0x14c   :  { %v665_v2 = vrot.slane %v661_v62, 4  ;;  %v666_v3 = vrot.slane %v662_v63, 4  ;;  %v586_v4 = vpop.permute.xlu1 %585  ;;  %v716_v6 = vld [vmem:[#allocation3 + $0x70] sm:$0xff]  ;;  %v715_v7 = vld [vmem:[#allocation3 + $0x58] sm:$0xff]  ;;  %v2136_v42 = vsel %vm534_vm13, 1, %v1844_v9  ;;  %vm426_vm9 = vcmp.ne.f32.partialorder %v425_v35, 0.0 }
 0x14d   :  { %771 = vmatprep.subr.mxu0 %v716_v6  ;;  %v2099_v11 = vpop.permute.xlu0 %691  ;;  %v543_v50 = vrot.slane %v2136_v42, %v1909_v20  ;;  %v427_v52 = vsel %vm426_vm9, 1, %v1844_v9  ;;  %vm464_vm13 = vcmp.ne.f32.partialorder %v463_v46, 0.0  ;;  %v609_v10 = vrot.slane %v2095_v0, %v1904_v17 }
 0x14e   :  { %669 = vst [vmem:[#allocation3 + $0x40] sm:$0xf0] %v665_v2  ;;  %670 = vst [vmem:[#allocation3 + $0x88] sm:$0xf0] %v666_v3  ;;  %v696_v12 = vsel %vm378_vm14, %v2099_v11, %v694_v54  ;;  %772 = vmatpush1.msra.mxu0 %v715_v7  ;;  %v435_v61 = vrot.slane %v427_v52, %v1909_v20  ;;  %v465_v63 = vsel %vm464_vm13, 1, %v1844_v9 }
 0x14f   :  { %v700_v16 = vsel %vm2090_vm6, %v696_v12, 0.0  ;;  %773 = vmatprep.subr.mxu0 %v712_v13  ;;  %vm2123_vm6 = vcmp.eq.s32.totalorder %v613_v14, 1  ;;  %v431_v14 = vrot.slane %v427_v52, %v1904_v17  ;;  %vm614_vm13 = vcmp.eq.s32.totalorder %v609_v10, 1 }
 0x150   :  { %702 = vst [vmem:[#allocation3 + $0x90] sm:$0xf] %v700_v16  ;;  %v624_v21 = vpop.permute.xlu1 %623  ;;  %774 = vmatpush1.msra.mxu0 %v711_v18  ;;  %vm437_vm9 = vcmp.eq.s32.totalorder %v435_v61, 1  ;;  %v469_v26 = vrot.slane %v465_v63, %v1904_v17 }
 0x151   :  { %775 = vmatprep.subr.mxu0 %v708_v22  ;;  %v584_v24 = vpop.permute.xlu0 %583  ;;  %v539_v22 = vrot.slane %v2136_v42, %v1904_v17 }
 0x152   :  { %v587_v27 = vsel %vm264_vm1, %v582_v41, %v584_v24  ;;  %v588_v28 = vsel %vm264_vm1, %v584_v24, %v586_v4  ;;  %776 = vmatpush1.msra.mxu0 %v707_v25  ;;  %v473_v4 = vrot.slane %v465_v63, %v1909_v20 }
 0x153   :  { %v591_v32 = vsel %vm2107_vm15, %v587_v27, 0.0  ;;  %v592_v33 = vsel %vm2111_vm0, %v588_v28, 0.0  ;;  %777 = vmatprep.subr.mxu0 %v704_v29  ;;  %vm506_vm15 = vcmp.eq.s32.totalorder %v501_v39, 1  ;;  %vm507_vm0 = vcmp.eq.s32.totalorder %v505_v40, 1 }
 0x154   :  { %v595_v36 = vrot.slane %v591_v32, 4  ;;  %v596_v37 = vrot.slane %v592_v33, 4  ;;  %v516_v38 = vpop.permute.xlu1 %515  ;;  %778 = vmatpush1.msra.mxu0 %v703_v34 }
 0x155   :  { %1739 = vmatmul.mubr.msk.f32.vlgmr.msra.gmra.mxu0 %vm730_vm4, %v2121_v30  ;;  %v622_v41 = vpop.permute.xlu0 %621 }
 0x156   :  { %599 = vst [vmem:[#allocation3 + $0x98] sm:$0xf0] %v595_v36  ;;  %600 = vst [vmem:[#allocation3 + $0x30] sm:$0xf0] %v596_v37  ;;  %v626_v43 = vsel %vm304_vm8, %v622_v41, %v624_v21  ;;  %1623 = vmatprep.mubr.f32.mxu0 %v1854_v49 }
 0x157   :  { %v630_v44 = vsel %vm2123_vm6, %v626_v43, 0.0  ;;  %v722_v45 = vld [vmem:[#allocation3 + $0x90] sm:$0xf]  ;;  %vm545_vm6 = vcmp.eq.s32.totalorder %v543_v50, 1 }
 0x158   :  { %632 = vst [vmem:[#allocation3 + $0x88] sm:$0xf] %v630_v44  ;;  %v554_v48 = vpop.permute.xlu1 %553  ;;  %1740 = vmatprep.subr.msk.mxu1 %vm734_vm10, %v722_v45 }
 0x159   :  { %v514_v51 = vpop.permute.xlu0 %513 }
 0x15a   :  { %v517_v57 = vsel %vm190_vm11, %v2083_v58, %v514_v51  ;;  %v518_v53 = vsel %vm190_vm11, %v514_v51, %v516_v38  ;;  %v679_v58 = vrot.slane %v2079_v47, %v1904_v17 }
 0x15b   :  { %v521_v54 = vsel %vm506_vm15, %v517_v57, 0.0  ;;  %v522_v55 = vsel %vm507_vm0, %v518_v53, 0.0  ;;  %vm475_vm0 = vcmp.eq.s32.totalorder %v473_v4, 1 }
 0x15c   :  { %v525_v56 = vrot.slane %v521_v54, 4  ;;  %v526_v59 = vrot.slane %v522_v55, 4  ;;  %v446_v60 = vpop.permute.xlu1 %445  ;;  %vm684_vm15 = vcmp.eq.s32.totalorder %v679_v58, 1 }
 0x15d   :  { %v552_v62 = vpop.permute.xlu0 %551 }
 0x15e   :  { %529 = vst [vmem:[#allocation3 + $0x18] sm:$0xf0] %v525_v56  ;;  %530 = vst [vmem:[#allocation3 + $0x20] sm:$0xf0] %v526_v59  ;;  %v556_v1 = vsel %vm230_vm2, %v552_v62, %v554_v48 }
 0x15f   :  { %v560_v2 = vsel %vm545_vm6, %v556_v1, 0.0  ;;  %vm436_vm6 = vcmp.eq.s32.totalorder %v431_v14, 1  ;;  %v718_v33 = vld [vmem:[#allocation3 + $0x88] sm:$0xff] }
 0x160   :  { %562 = vst [vmem:[#allocation3 + $0x30] sm:$0xf] %v560_v2  ;;  %v484_v3 = vpop.permute.xlu1 %483 }
 0x161   :  { %v444_v6 = vpop.permute.xlu0 %443 }
 0x162   :  { %v448_v7 = vsel %vm116_vm12, %v444_v6, %v446_v60 }
 0x163   :  { %v452_v8 = vsel %vm437_vm9, %v448_v7, 0.0  ;;  %vm544_vm9 = vcmp.eq.s32.totalorder %v539_v22, 1 }
 0x164   :  { %v456_v12 = vrot.slane %v452_v8, 4  ;;  %v690_v13 = vpop.permute.xlu1 %689 }
 0x165   :  { %v695_v47 = vsel %vm378_vm14, %v690_v13, %v2099_v11  ;;  %v482_v16 = vpop.permute.xlu0 %481 }
 0x166   :  { %460 = vst [vmem:[#allocation3 + $0x80] sm:$0xf0] %v456_v12  ;;  %v699_v18 = vsel %vm684_vm15, %v695_v47, 0.0  ;;  %v486_v19 = vsel %vm156_vm7, %v482_v16, %v484_v3  ;;  %vm474_vm15 = vcmp.eq.s32.totalorder %v469_v26, 1 }
 0x167   :  { %701 = vst [vmem:[#allocation3 + $0x50] sm:$0xf] %v699_v18  ;;  %v490_v21 = vsel %vm475_vm0, %v486_v19, 0.0  ;;  %v714_v38 = vld [vmem:[#allocation3 + $0x30] sm:$0xff] }
 0x168   :  { %492 = vst [vmem:[#allocation3 + $0x20] sm:$0xf] %v490_v21  ;;  %v620_v0 = vpop.permute.xlu1 %619  ;;  %v1217_v19 = vld [vmem:[#allocation5] ss:$8 sm:$0x3] }
 0x169   :  { %v625_v23 = vsel %vm304_vm8, %v620_v0, %v622_v41  ;;  %v442_v5 = vpop.permute.xlu0 %441 }
 0x16a   :  { %v629_v24 = vsel %vm614_vm13, %v625_v23, 0.0  ;;  %v447_v11 = vsel %vm116_vm12, %v442_v5, %v444_v6  ;;  %vm2489_vm13 = vcmask 134144  }
 0x16b   :  { %631 = vst [vmem:[#allocation3 + $0x40] sm:$0xf] %v629_v24  ;;  %v451_v25 = vsel %vm436_vm6, %v447_v11, 0.0 }
 0x16c   :  { %v455_v27 = vrot.slane %v451_v25, 4  ;;  %v550_v28 = vpop.permute.xlu1 %549 }
 0x16d   :  { %v555_v29 = vsel %vm230_vm2, %v550_v28, %v552_v62  ;;  %v706_v42 = vld [vmem:[#allocation3 + $0x80] sm:$0xff] }
 0x16e   :  { %459 = vst [vmem:[#allocation3 + $0x48] sm:$0xf0] %v455_v27  ;;  %v559_v31 = vsel %vm544_vm9, %v555_v29, 0.0  ;;  %v721_v32 = vld [vmem:[#allocation3 + $0x50] sm:$0xf] }
 0x16f   :  { %561 = vst [vmem:[#allocation3 + $0x98] sm:$0xf] %v559_v31  ;;  %1741 = vmatpush1.msk.msra.mxu1 %vm734_vm10, %v721_v32  ;;  %v710_v40 = vld [vmem:[#allocation3 + $0x20] sm:$0xff] }
 0x170   :  { %v480_v34 = vpop.permute.xlu1 %479  ;;  %842 = vmatprep.subr.mxu1 %v718_v33 }
 0x171   :  { %v485_v35 = vsel %vm156_vm7, %v480_v34, %v482_v16 }
 0x172   :  { %v489_v36 = vsel %vm474_vm15, %v485_v35, 0.0  ;;  %v717_v37 = vld [vmem:[#allocation3 + $0x40] sm:$0xff]  ;;  %vm1218_vm15 = vcmp.ne.f32.partialorder %v1217_v19, 0.0 }
 0x173   :  { %491 = vst [vmem:[#allocation3 + $0x18] sm:$0xf] %v489_v36  ;;  %843 = vmatpush1.msra.mxu1 %v717_v37  ;;  %v1219_v23 = vsel %vm1218_vm15, 1, %v1844_v9  ;;  %v1538_v36 = vld [vmem:[%s2465_s5] sm:$0xf] }
 0x174   :  { %844 = vmatprep.subr.mxu1 %v714_v38  ;;  %v1223_v5 = vrot.slane %v1219_v23, %v1904_v17  ;;  %v1227_v24 = vrot.slane %v1219_v23, %v1909_v20  ;;  %v1137_v37 = vld [vmem:[#allocation5 + $0x7] ss:$8 sm:$0x3] }
 0x175   :  { %v705_v43 = vld [vmem:[#allocation3 + $0x48] sm:$0xff] }
 0x176   :  { %v713_v39 = vld [vmem:[#allocation3 + $0x98] sm:$0xff]  ;;  %v728_v44 = vpop.permute.xlu0 %727 }
 0x177   :  { %845 = vmatpush1.msra.mxu1 %v713_v39 }
 0x178   :  { %846 = vmatprep.subr.mxu1 %v710_v40  ;;  %v1175_v40 = vld [vmem:[#allocation5 + $0x10] ss:$8 sm:$0x3] }
 0x17a   :  { %v709_v41 = vld [vmem:[#allocation3 + $0x18] sm:$0xff] }
 0x17b   :  { %847 = vmatpush1.msra.mxu1 %v709_v41 }
 0x17c   :  { %848 = vmatprep.subr.mxu1 %v706_v42 }
 0x17d   :  { %849 = vmatpush1.msra.mxu1 %v705_v43 }
 0x17e   :  { %1742 = vmatmul.mubr.msk.f32.vlgmr.msra.gmra.mxu1 %vm730_vm4, %v2121_v30 }
 0x17f   :  { %1694 = vmatprep.mubr.f32.mxu1 %v1854_v49  ;;  %v905_v49 = vld [vmem:[#allocation5] ss:$8 sm:$0x3] }
 0x180   :  { %vm906_vm0 = vcmp.ne.f32.partialorder %v905_v49, 0.0 }
 0x181   :  { %v907_v1 = vsel %vm906_vm0, 1, %v1844_v9  ;;  %vm2490_vm0 = vmmov %vm2489_vm13 }
 0x182   :  { %v911_v2 = vrot.slane %v907_v1, %v1904_v17  ;;  %v915_v58 = vrot.slane %v907_v1, %v1909_v20 }
 0x184   :  { %vm916_vm6 = vcmp.eq.s32.totalorder %v911_v2, 1  ;;  %vm917_vm9 = vcmp.eq.s32.totalorder %v915_v58, 1 }
 0x215   :  { %v813_v45 = vpop.f32.mrf.mxu0 }
 0x216   :  { %v814_v46 = vadd.f32 %v813_v45, %v728_v44 }
 0x217   :  { %v815_v48 = vpop.f32.mrf.mxu0 }
 0x218   :  { %v816_v50 = vadd.f32 %v815_v48, %v728_v44  ;;  %v889_v51 = vmax.f32 %v814_v46, 0.0 }
 0x21a   :  { %v890_v52 = vmax.f32 %v816_v50, 0.0 }
 0x21c   :  { %v895_v57 = vcombine.low %v889_v51, %v890_v52  ;;  %v1105_v52 = vld [vmem:[#allocation5 + $0x6] ss:$8 sm:$0x3] }
 0x21e   :  { %896 = vrot.lane.b32.xlu1 %v895_v57, %s1845_s0 }
 0x23e   :  { %v884_v53 = vpop.f32.mrf.mxu1 }
 0x23f   :  { %v885_v54 = vadd.f32 %v884_v53, %v728_v44 }
 0x240   :  { %v886_v55 = vpop.f32.mrf.mxu1 }
 0x241   :  { %v887_v56 = vadd.f32 %v886_v55, %v728_v44  ;;  %v891_v59 = vmax.f32 %v885_v54, 0.0  ;;  %v1067_v44 = vld [vmem:[#allocation5 + $0x5] ss:$8 sm:$0x3] }
 0x243   :  { %v892_v60 = vmax.f32 %v887_v56, 0.0 }
 0x245   :  { %v1207_v61 = vcombine.low %v891_v59, %v892_v60 }
 0x247   :  { %1208 = vrot.lane.b32.xlu1 %v1207_v61, %s1845_s0 }
 0x290   :  { %v897_v30 = vpop.permute.xlu1 %896 }
 0x291   :  { %v898_v62 = vrot.slane %v897_v30, 4 }
 0x293   :  { %v899_v63 = vsel %vm60_vm3, %v898_v62, %v897_v30  ;;  %903 = vst.msk [vmem:[#allocation2 + $0x8] sm:$0xf] %vm2489_vm13, %v898_v62  ;;  %vm1229_vm13 = vcmp.eq.s32.totalorder %v1227_v24, 1  ;;  %v997_v62 = vld [vmem:[#allocation5 + $0x3] ss:$8 sm:$0x3] }
 0x294   :  { %902 = vst.msk [vmem:[#allocation2] sm:$0xff] %vm1900_vm5, %v899_v63 }
 0x29a   :  { %v1136_v3 = vld [vmem:[#allocation2 + $0x8] sm:$0xf] }
 0x29b   :  { %1157 = vrot.lane.b32.xlu1 %v1136_v3, %s1846_s1  ;;  %v2183_v4 = vld [vmem:[#allocation2] sm:$0xff]  ;;  %v1174_v8 = vld [vmem:[#allocation2 + $0x8] sm:$0xf] }
 0x29c   :  { %1153 = vrot.lane.b32.xlu0 %v2183_v4, %s1846_s1  ;;  %v1152_v6 = vcombine.high %v2183_v4, %v2183_v4  ;;  %v921_v7 = vsel %vm916_vm6, %v2183_v4, 0.0  ;;  %v1066_v12 = vld [vmem:[#allocation2 + $0x8] sm:$0xf]  ;;  %vm1176_vm6 = vcmp.ne.f32.partialorder %v1175_v40, 0.0 }
 0x29d   :  { %923 = vst [vmem:[#allocation4 + $0x48] sm:$0xf] %v921_v7  ;;  %v1104_v13 = vld [vmem:[#allocation2 + $0x8] sm:$0xf]  ;;  %v2257_v50 = vsel %vm1176_vm6, 1, %v1844_v9 }
 0x29e   :  { %v922_v10 = vsel %vm917_vm9, %v1152_v6, 0.0  ;;  %v996_v14 = vld [vmem:[#allocation2 + $0x8] sm:$0xf]  ;;  %vm1068_vm9 = vcmp.ne.f32.partialorder %v1067_v44, 0.0  ;;  %v1185_v57 = vrot.slane %v2257_v50, %v1909_v20 }
 0x29f   :  { %1195 = vrot.lane.b32.xlu1 %v1174_v8, %s1847_s9  ;;  %924 = vst [vmem:[#allocation4 + $0x68] sm:$0xf] %v922_v10  ;;  %v1034_v47 = vld [vmem:[#allocation2 + $0x8] sm:$0xf]  ;;  %v1069_v54 = vsel %vm1068_vm9, 1, %v1844_v9  ;;  %vm998_vm9 = vcmp.ne.f32.partialorder %v997_v62, 0.0 }
 0x2a0   :  { %1083 = vrot.lane.b32.xlu0 %v2183_v4, %s1848_s10  ;;  %v926_v16 = vld [vmem:[#allocation2 + $0x8] sm:$0xf]  ;;  %vm2266_vm6 = vcmp.eq.s32.totalorder %v1185_v57, 1  ;;  %v1073_v30 = vrot.slane %v1069_v54, %v1904_v17  ;;  %v1077_v58 = vrot.slane %v1069_v54, %v1909_v20  ;;  %v1035_v10 = vld [vmem:[#allocation5 + $0x4] ss:$8 sm:$0x3] }
 0x2a1   :  { %v964_v18 = vld [vmem:[#allocation2 + $0x8] sm:$0xf] }
 0x2a3   :  { %1087 = vrot.lane.b32.xlu1 %v1066_v12, %s1848_s10 }
 0x2a4   :  { %1013 = vrot.lane.b32.xlu0 %v2183_v4, %s1849_s11 }
 0x2a7   :  { %1125 = vrot.lane.b32.xlu1 %v1104_v13, %s1850_s12 }
 0x2a8   :  { %1155 = vrot.lane.b32.xlu0 %v1152_v6, %s1846_s1 }
 0x2ab   :  { %1017 = vrot.lane.b32.xlu1 %v996_v14, %s1849_s11  ;;  %v999_v14 = vsel %vm998_vm9, 1, %v1844_v9 }
 0x2ac   :  { %1193 = vrot.lane.b32.xlu0 %v1152_v6, %s1847_s9  ;;  %v1003_v24 = vrot.slane %v999_v14, %v1904_v17 }
 0x2af   :  { %1055 = vrot.lane.b32.xlu1 %v1034_v47, %s1852_s14 }
 0x2b0   :  { %1085 = vrot.lane.b32.xlu0 %v1152_v6, %s1848_s10 }
 0x2b3   :  { %947 = vrot.lane.b32.xlu1 %v926_v16, %s1851_s13 }
 0x2b4   :  { %1123 = vrot.lane.b32.xlu0 %v1152_v6, %s1850_s12 }
 0x2b7   :  { %985 = vrot.lane.b32.xlu1 %v964_v18, %s1853_s15 }
 0x2b8   :  { %1015 = vrot.lane.b32.xlu0 %v1152_v6, %s1849_s11 }
 0x2b9   :  { %v1209_v21 = vpop.permute.xlu1 %1208 }
 0x2ba   :  { %v1210_v22 = vrot.slane %v1209_v21, 4 }
 0x2bb   :  { %1191 = vrot.lane.b32.xlu1 %v2183_v4, %s1847_s9 }
 0x2bc   :  { %v1211_v0 = vsel %vm60_vm3, %v1210_v22, %v1209_v21  ;;  %1215 = vst.msk [vmem:[#allocation2 + $0x8] sm:$0xf] %vm2490_vm0, %v1210_v22  ;;  %1053 = vrot.lane.b32.xlu0 %v1152_v6, %s1852_s14  ;;  %vm1228_vm3 = vcmp.eq.s32.totalorder %v1223_v5, 1  ;;  %v927_v22 = vld [vmem:[#allocation5 + $0x1] ss:$8 sm:$0x3] }
 0x2bd   :  { %1214 = vst.msk [vmem:[#allocation2] sm:$0xff] %vm1900_vm5, %v1211_v0  ;;  %vm1138_vm5 = vcmp.ne.f32.partialorder %v1137_v37, 0.0 }
 0x2be   :  { %v1139_v43 = vsel %vm1138_vm5, 1, %v1844_v9 }
 0x2bf   :  { %1121 = vrot.lane.b32.xlu1 %v2183_v4, %s1850_s12  ;;  %v1143_v46 = vrot.slane %v1139_v43, %v1904_v17  ;;  %v1147_v48 = vrot.slane %v1139_v43, %v1909_v20 }
 0x2c0   :  { %945 = vrot.lane.b32.xlu0 %v1152_v6, %s1851_s13 }
 0x2c1   :  { %vm1148_vm15 = vcmp.eq.s32.totalorder %v1143_v46, 1  ;;  %vm1149_vm0 = vcmp.eq.s32.totalorder %v1147_v48, 1 }
 0x2c3   :  { %1051 = vrot.lane.b32.xlu1 %v2183_v4, %s1852_s14  ;;  %v1448_v15 = vld [vmem:[#allocation2 + $0x8] sm:$0xf] }
 0x2c4   :  { %983 = vrot.lane.b32.xlu0 %v1152_v6, %s1853_s15  ;;  %v1447_v11 = vld [vmem:[#allocation2] sm:$0xff]  ;;  %v1486_v28 = vld [vmem:[#allocation2 + $0x8] sm:$0xf] }
 0x2c5   :  { %v1464_v25 = vcombine.high %v1447_v11, %v1447_v11  ;;  %v1233_v26 = vsel %vm1228_vm3, %v1447_v11, 0.0  ;;  %v1378_v29 = vld [vmem:[#allocation2 + $0x8] sm:$0xf]  ;;  %vm1106_vm3 = vcmp.ne.f32.partialorder %v1105_v52, 0.0 }
 0x2c6   :  { %1235 = vst [vmem:[#allocation4 + $0x80] sm:$0xf] %v1233_v26  ;;  %v1416_v31 = vld [vmem:[#allocation2 + $0x8] sm:$0xf]  ;;  %v2273_v3 = vsel %vm1106_vm3, 1, %v1844_v9  ;;  %vm1036_vm3 = vcmp.ne.f32.partialorder %v1035_v10, 0.0 }
 0x2c7   :  { %1469 = vrot.lane.b32.xlu1 %v1448_v15, %s1846_s1  ;;  %v1234_v27 = vsel %vm1229_vm13, %v1464_v25, 0.0  ;;  %v1308_v32 = vld [vmem:[#allocation2 + $0x8] sm:$0xf]  ;;  %vm2491_vm13 = vcmask 777216   ;;  %v1115_v8 = vrot.slane %v2273_v3, %v1909_v20  ;;  %v1037_v15 = vsel %vm1036_vm3, 1, %v1844_v9 }
 0x2c8   :  { %1465 = vrot.lane.b32.xlu0 %v1447_v11, %s1846_s1  ;;  %1236 = vst [vmem:[#allocation4 + $0x8] sm:$0xf] %v1234_v27  ;;  %v1346_v33 = vld [vmem:[#allocation2 + $0x8] sm:$0xf]  ;;  %vm2492_vm5 = vmmov %vm2491_vm13  ;;  %v1111_v40 = vrot.slane %v2273_v3, %v1904_v17  ;;  %v1041_v57 = vrot.slane %v1037_v15, %v1904_v17 }
 0x2c9   :  { %v1238_v34 = vld [vmem:[#allocation2 + $0x8] sm:$0xf] }
 0x2ca   :  { %v1276_v35 = vld [vmem:[#allocation2 + $0x8] sm:$0xf] }
 0x2cb   :  { %1507 = vrot.lane.b32.xlu1 %v1486_v28, %s1847_s9 }
 0x2cc   :  { %1395 = vrot.lane.b32.xlu0 %v1447_v11, %s1848_s10 }
 0x2cf   :  { %1399 = vrot.lane.b32.xlu1 %v1378_v29, %s1848_s10  ;;  %v1181_v29 = vrot.slane %v2257_v50, %v1904_v17 }
 0x2d0   :  { %1325 = vrot.lane.b32.xlu0 %v1447_v11, %s1849_s11 }
 0x2d3   :  { %1437 = vrot.lane.b32.xlu1 %v1416_v31, %s1850_s12  ;;  %v965_v31 = vld [vmem:[#allocation5 + $0x2] ss:$8 sm:$0x3] }
 0x2d4   :  { %1255 = vrot.lane.b32.xlu0 %v1447_v11, %s1851_s13 }
 0x2d7   :  { %1329 = vrot.lane.b32.xlu1 %v1308_v32, %s1849_s11 }
 0x2d8   :  { %1467 = vrot.lane.b32.xlu0 %v1464_v25, %s1846_s1 }
 0x2db   :  { %1367 = vrot.lane.b32.xlu1 %v1346_v33, %s1852_s14  ;;  %v1045_v33 = vrot.slane %v1037_v15, %v1909_v20  ;;  %v1417_v15 = vld [vmem:[#allocation5 + $0x6] ss:$8 sm:$0x3] }
 0x2dc   :  { %1505 = vrot.lane.b32.xlu0 %v1464_v25, %s1847_s9 }
 0x2dd   :  { %vm1047_vm3 = vcmp.eq.s32.totalorder %v1045_v33, 1 }
 0x2df   :  { %1259 = vrot.lane.b32.xlu1 %v1238_v34, %s1851_s13 }
 0x2e0   :  { %1397 = vrot.lane.b32.xlu0 %v1464_v25, %s1848_s10 }
 0x2e3   :  { %1297 = vrot.lane.b32.xlu1 %v1276_v35, %s1853_s15 }
 0x2e4   :  { %1435 = vrot.lane.b32.xlu0 %v1464_v25, %s1850_s12 }
 0x2e7   :  { %1503 = vrot.lane.b32.xlu1 %v1447_v11, %s1847_s9 }
 0x2e8   :  { %1327 = vrot.lane.b32.xlu0 %v1464_v25, %s1849_s11 }
 0x2eb   :  { %1433 = vrot.lane.b32.xlu1 %v1447_v11, %s1850_s12 }
 0x2ec   :  { %1365 = vrot.lane.b32.xlu0 %v1464_v25, %s1852_s14 }
 0x2ef   :  { %1363 = vrot.lane.b32.xlu1 %v1447_v11, %s1852_s14 }
 0x2f0   :  { %1257 = vrot.lane.b32.xlu0 %v1464_v25, %s1851_s13 }
 0x2f3   :  { %1293 = vrot.lane.b32.xlu1 %v1447_v11, %s1853_s15  ;;  %v1007_v11 = vrot.slane %v999_v14, %v1909_v20 }
 0x2f4   :  { %1295 = vrot.lane.b32.xlu0 %v1464_v25, %s1853_s15 }
 0x2f5   :  { %vm1009_vm9 = vcmp.eq.s32.totalorder %v1007_v11, 1 }
 0x2f7   :  { %981 = vrot.lane.b32.xlu1 %v2183_v4, %s1853_s15 }
 0x2f8   :  { %943 = vrot.lane.b32.xlu0 %v2183_v4, %s1851_s13 }
 0x2fc   :  { %1541 = vperm.xlu0 %1765, %v1538_v36  }
 0x30d   :  { %v1158_v38 = vpop.permute.xlu1 %1157 }
 0x30e   :  { %v1154_v39 = vpop.permute.xlu0 %1153 }
 0x311   :  { %v1196_v41 = vpop.permute.xlu1 %1195 }
 0x312   :  { %v1084_v42 = vpop.permute.xlu0 %1083 }
 0x315   :  { %v1088_v45 = vpop.permute.xlu1 %1087 }
 0x316   :  { %v2259_v51 = vpop.permute.xlu0 %1013 }
 0x319   :  { %v1126_v53 = vpop.permute.xlu1 %1125 }
 0x31a   :  { %v1156_v55 = vpop.permute.xlu0 %1155 }
 0x31b   :  { %v1159_v56 = vsel %vm2491_vm13, %v1154_v39, %v1156_v55  ;;  %v1160_v59 = vsel %vm2492_vm5, %v1156_v55, %v1158_v38  ;;  %vm2283_vm13 = vcmp.eq.s32.totalorder %v1115_v8, 1  ;;  %vm928_vm5 = vcmp.ne.f32.partialorder %v927_v22, 0.0 }
 0x31c   :  { %v1163_v60 = vsel %vm1148_vm15, %v1159_v56, 0.0  ;;  %v1164_v61 = vsel %vm1149_vm0, %v1160_v59, 0.0  ;;  %vm1078_vm15 = vcmp.eq.s32.totalorder %v1073_v30, 1  ;;  %vm1079_vm0 = vcmp.eq.s32.totalorder %v1077_v58, 1 }
 0x31d   :  { %v1167_v63 = vrot.slane %v1163_v60, 4  ;;  %v1168_v1 = vrot.slane %v1164_v61, 4  ;;  %v1018_v2 = vpop.permute.xlu1 %1017  ;;  %v2298_v35 = vsel %vm928_vm5, 1, %v1844_v9 }
 0x31e   :  { %v1194_v4 = vpop.permute.xlu0 %1193  ;;  %v937_v44 = vrot.slane %v2298_v35, %v1909_v20 }
 0x31f   :  { %1171 = vst [vmem:[#allocation4] sm:$0xf0] %v1167_v63  ;;  %1172 = vst [vmem:[#allocation4 + $0x40] sm:$0xf0] %v1168_v1  ;;  %v1198_v6 = vsel %vm378_vm14, %v1194_v4, %v1196_v41 }
 0x320   :  { %v1202_v7 = vsel %vm2266_vm6, %v1198_v6, 0.0  ;;  %vm1008_vm6 = vcmp.eq.s32.totalorder %v1003_v24, 1  ;;  %vm939_vm5 = vcmp.eq.s32.totalorder %v937_v44, 1 }
 0x321   :  { %1204 = vst [vmem:[#allocation4 + $0x90] sm:$0xf] %v1202_v7  ;;  %v1056_v12 = vpop.permute.xlu1 %1055 }
 0x322   :  { %v1086_v13 = vpop.permute.xlu0 %1085 }
 0x323   :  { %v1089_v47 = vsel %vm264_vm1, %v1084_v42, %v1086_v13  ;;  %v1090_v16 = vsel %vm264_vm1, %v1086_v13, %v1088_v45 }
 0x324   :  { %v1093_v18 = vsel %vm1078_vm15, %v1089_v47, 0.0  ;;  %v1094_v19 = vsel %vm1079_vm0, %v1090_v16, 0.0  ;;  %vm966_vm15 = vcmp.ne.f32.partialorder %v965_v31, 0.0  ;;  %vm1186_vm0 = vcmp.eq.s32.totalorder %v1181_v29, 1 }
 0x325   :  { %v1097_v0 = vrot.slane %v1093_v18, 4  ;;  %v1098_v23 = vrot.slane %v1094_v19, 4  ;;  %v948_v5 = vpop.permute.xlu1 %947  ;;  %v2309_v48 = vsel %vm966_vm15, 1, %v1844_v9  ;;  %v1487_v47 = vld [vmem:[#allocation5 + $0x10] ss:$8 sm:$0x3] }
 0x326   :  { %v1124_v25 = vpop.permute.xlu0 %1123  ;;  %v975_v54 = vrot.slane %v2309_v48, %v1909_v20 }
 0x327   :  { %1101 = vst [vmem:[#allocation4 + $0x50] sm:$0xf0] %v1097_v0  ;;  %1102 = vst [vmem:[#allocation4 + $0x60] sm:$0xf0] %v1098_v23  ;;  %v1128_v26 = vsel %vm304_vm8, %v1124_v25, %v1126_v53 }
 0x328   :  { %v1132_v27 = vsel %vm2283_vm13, %v1128_v26, 0.0  ;;  %v1535_v28 = vld [vmem:[#allocation4 + $0x90] sm:$0xf]  ;;  %vm1116_vm13 = vcmp.eq.s32.totalorder %v1111_v40, 1 }
 0x329   :  { %1134 = vst [vmem:[#allocation4 + $0x40] sm:$0xf] %v1132_v27  ;;  %1743 = vmatprep.subr.msk.mxu0 %vm734_vm10, %v1535_v28  ;;  %v986_v32 = vpop.permute.xlu1 %985  ;;  %v1379_v23 = vld [vmem:[#allocation5 + $0x5] ss:$8 sm:$0x3] }
 0x32a   :  { %v1016_v34 = vpop.permute.xlu0 %1015 }
 0x32b   :  { %v1019_v36 = vsel %vm190_vm11, %v2259_v51, %v1016_v34  ;;  %v1020_v37 = vsel %vm190_vm11, %v1016_v34, %v1018_v2 }
 0x32c   :  { %v1023_v38 = vsel %vm1008_vm6, %v1019_v36, 0.0  ;;  %v1024_v39 = vsel %vm1009_vm9, %v1020_v37, 0.0  ;;  %vm1046_vm6 = vcmp.eq.s32.totalorder %v1041_v57, 1  ;;  %vm977_vm9 = vcmp.eq.s32.totalorder %v975_v54, 1 }
 0x32d   :  { %v1027_v41 = vrot.slane %v1023_v38, 4  ;;  %v1028_v42 = vrot.slane %v1024_v39, 4  ;;  %v1192_v43 = vpop.permute.xlu1 %1191  ;;  %v1309_v38 = vld [vmem:[#allocation5 + $0x3] ss:$8 sm:$0x3] }
 0x32e   :  { %v1197_v45 = vsel %vm378_vm14, %v1192_v43, %v1194_v4  ;;  %v1054_v46 = vpop.permute.xlu0 %1053 }
 0x32f   :  { %1031 = vst [vmem:[#allocation4 + $0x38] sm:$0xf0] %v1027_v41  ;;  %1032 = vst [vmem:[#allocation4 + $0x28] sm:$0xf0] %v1028_v42  ;;  %v1201_v50 = vsel %vm1186_vm0, %v1197_v45, 0.0  ;;  %v1058_v51 = vsel %vm230_vm2, %v1054_v46, %v1056_v12  ;;  %vm1488_vm0 = vcmp.ne.f32.partialorder %v1487_v47, 0.0 }
 0x330   :  { %1203 = vst [vmem:[#allocation4 + $0x78] sm:$0xf] %v1201_v50  ;;  %v1062_v52 = vsel %vm1047_vm3, %v1058_v51, 0.0  ;;  %v1531_v4 = vld [vmem:[#allocation4 + $0x40] sm:$0xff]  ;;  %v2330_v0 = vsel %vm1488_vm0, 1, %v1844_v9  ;;  %vm1380_vm3 = vcmp.ne.f32.partialorder %v1379_v23, 0.0 }
 0x331   :  { %1064 = vst [vmem:[#allocation4 + $0x60] sm:$0xf] %v1062_v52  ;;  %v1122_v53 = vpop.permute.xlu1 %1121  ;;  %v1449_v12 = vld [vmem:[#allocation5 + $0x7] ss:$8 sm:$0x3]  ;;  %v1497_v26 = vrot.slane %v2330_v0, %v1909_v20  ;;  %v1381_v29 = vsel %vm1380_vm3, 1, %v1844_v9 }
 0x332   :  { %v1127_v55 = vsel %vm304_vm8, %v1122_v53, %v1124_v25  ;;  %v2316_v56 = vpop.permute.xlu0 %945  ;;  %vm1450_vm15 = vcmp.ne.f32.partialorder %v1449_v12, 0.0  ;;  %v1385_v42 = vrot.slane %v1381_v29, %v1904_v17  ;;  %v1389_v43 = vrot.slane %v1381_v29, %v1909_v20  ;;  %v1347_v45 = vld [vmem:[#allocation5 + $0x4] ss:$8 sm:$0x3] }
 0x333   :  { %v1131_v59 = vsel %vm1116_vm13, %v1127_v55, 0.0  ;;  %v950_v60 = vsel %vm116_vm12, %v2316_v56, %v948_v5  ;;  %v1451_v22 = vsel %vm1450_vm15, 1, %v1844_v9  ;;  %vm2343_vm0 = vcmp.eq.s32.totalorder %v1497_v26, 1  ;;  %v1277_v12 = vld [vmem:[#allocation5 + $0x2] ss:$8 sm:$0x3] }
 0x334   :  { %1133 = vst [vmem:[#allocation4] sm:$0xf] %v1131_v59  ;;  %v954_v61 = vsel %vm939_vm5, %v950_v60, 0.0  ;;  %v1455_v24 = vrot.slane %v1451_v22, %v1904_v17  ;;  %v1459_v11 = vrot.slane %v1451_v22, %v1909_v20  ;;  %vm1310_vm3 = vcmp.ne.f32.partialorder %v1309_v38, 0.0 }
 0x335   :  { %v958_v49 = vrot.slane %v954_v61, 4  ;;  %v1052_v30 = vpop.permute.xlu1 %1051  ;;  %v1311_v53 = vsel %vm1310_vm3, 1, %v1844_v9  ;;  %v1239_v60 = vld [vmem:[#allocation5 + $0x1] ss:$8 sm:$0x3] }
 0x336   :  { %v1057_v62 = vsel %vm230_vm2, %v1052_v30, %v1054_v46  ;;  %v2321_v63 = vpop.permute.xlu0 %983  ;;  %vm1460_vm13 = vcmp.eq.s32.totalorder %v1455_v24, 1  ;;  %vm1461_vm5 = vcmp.eq.s32.totalorder %v1459_v11, 1  ;;  %v1493_v30 = vrot.slane %v2330_v0, %v1904_v17 }
 0x337   :  { %962 = vst [vmem:[#allocation4 + $0x68] sm:$0xf0] %v958_v49  ;;  %v1061_v1 = vsel %vm1046_vm6, %v1057_v62, 0.0  ;;  %v988_v2 = vsel %vm156_vm7, %v2321_v63, %v986_v32  ;;  %v1534_v58 = vld [vmem:[#allocation4 + $0x78] sm:$0xf]  ;;  %vm1418_vm6 = vcmp.ne.f32.partialorder %v1417_v15, 0.0 }
 0x338   :  { %1063 = vst [vmem:[#allocation4 + $0x50] sm:$0xf] %v1061_v1  ;;  %v992_v3 = vsel %vm977_vm9, %v988_v2, 0.0  ;;  %1744 = vmatpush1.msk.msra.mxu0 %vm734_vm10, %v1534_v58  ;;  %v1527_v10 = vld [vmem:[#allocation4 + $0x60] sm:$0xff]  ;;  %vm2497_vm9 = vcmask 777216   ;;  %v1419_v37 = vsel %vm1418_vm6, 1, %v1844_v9 }
 0x339   :  { %994 = vst [vmem:[#allocation4 + $0x28] sm:$0xf] %v992_v3  ;;  %1583 = vmatprep.subr.mxu0 %v1531_v4  ;;  %v1470_v6 = vpop.permute.xlu1 %1469  ;;  %vm2498_vm15 = vmmov %vm2497_vm9  ;;  %v1427_v50 = vrot.slane %v1419_v37, %v1909_v20  ;;  %vm1348_vm6 = vcmp.ne.f32.partialorder %v1347_v45, 0.0  ;;  %v1315_v3 = vrot.slane %v1311_v53, %v1904_v17  ;;  %v1319_v4 = vrot.slane %v1311_v53, %v1909_v20 }
 0x33a   :  { %v1466_v7 = vpop.permute.xlu0 %1465  ;;  %v1349_v62 = vsel %vm1348_vm6, 1, %v1844_v9 }
 0x33b   :  { %v1530_v8 = vld [vmem:[#allocation4] sm:$0xff]  ;;  %vm2382_vm3 = vcmp.eq.s32.totalorder %v1319_v4, 1  ;;  %v1353_v29 = vrot.slane %v1349_v62, %v1904_v17 }
 0x33c   :  { %1584 = vmatpush1.msra.mxu0 %v1530_v8 }
 0x33d   :  { %1585 = vmatprep.subr.mxu0 %v1527_v10  ;;  %v1508_v13 = vpop.permute.xlu1 %1507  ;;  %v1357_v10 = vrot.slane %v1349_v62, %v1909_v20 }
 0x33e   :  { %v1396_v14 = vpop.permute.xlu0 %1395 }
 0x33f   :  { %v1526_v16 = vld [vmem:[#allocation4 + $0x50] sm:$0xff]  ;;  %vm2396_vm6 = vcmp.eq.s32.totalorder %v1357_v10, 1 }
 0x340   :  { %1586 = vmatpush1.msra.mxu0 %v1526_v16  ;;  %v1523_v18 = vld [vmem:[#allocation4 + $0x28] sm:$0xff] }
 0x341   :  { %1587 = vmatprep.subr.mxu0 %v1523_v18  ;;  %v1400_v19 = vpop.permute.xlu1 %1399 }
 0x342   :  { %v2326_v21 = vpop.permute.xlu0 %1325 }
 0x345   :  { %v1438_v5 = vpop.permute.xlu1 %1437 }
 0x346   :  { %v2334_v25 = vpop.permute.xlu0 %1255 }
 0x349   :  { %v2338_v27 = vpop.permute.xlu1 %1329 }
 0x34a   :  { %v1468_v28 = vpop.permute.xlu0 %1467 }
 0x34b   :  { %v1471_v31 = vsel %vm2497_vm9, %v1466_v7, %v1468_v28  ;;  %v1472_v32 = vsel %vm2498_vm15, %v1468_v28, %v1470_v6  ;;  %vm2361_vm9 = vcmp.eq.s32.totalorder %v1427_v50, 1  ;;  %v1423_v7 = vrot.slane %v1419_v37, %v1904_v17 }
 0x34c   :  { %v1475_v34 = vsel %vm1460_vm13, %v1471_v31, 0.0  ;;  %v1476_v36 = vsel %vm1461_vm5, %v1472_v32, 0.0  ;;  %vm1390_vm13 = vcmp.eq.s32.totalorder %v1385_v42, 1  ;;  %vm1391_vm5 = vcmp.eq.s32.totalorder %v1389_v43, 1 }
 0x34d   :  { %v1479_v39 = vrot.slane %v1475_v34, 4  ;;  %v1480_v40 = vrot.slane %v1476_v36, 4  ;;  %v2348_v41 = vpop.permute.xlu1 %1367  ;;  %vm1498_vm15 = vcmp.eq.s32.totalorder %v1493_v30, 1 }
 0x34e   :  { %v1506_v44 = vpop.permute.xlu0 %1505 }
 0x34f   :  { %1483 = vst [vmem:[#allocation4 + $0x30] sm:$0xf0] %v1479_v39  ;;  %1484 = vst [vmem:[#allocation4 + $0x18] sm:$0xf0] %v1480_v40  ;;  %v1510_v46 = vsel %vm378_vm14, %v1506_v44, %v1508_v13 }
 0x350   :  { %v1514_v51 = vsel %vm2343_vm0, %v1510_v46, 0.0  ;;  %vm2378_vm0 = vcmp.eq.s32.totalorder %v1315_v3, 1 }
 0x351   :  { %1516 = vst [vmem:[#allocation4 + $0x88] sm:$0xf] %v1514_v51  ;;  %v2356_v52 = vpop.permute.xlu1 %1259 }
 0x352   :  { %v1398_v57 = vpop.permute.xlu0 %1397 }
 0x353   :  { %v1401_v54 = vsel %vm264_vm1, %v1396_v14, %v1398_v57  ;;  %v1402_v55 = vsel %vm264_vm1, %v1398_v57, %v1400_v19  ;;  %vm1240_vm1 = vcmp.ne.f32.partialorder %v1239_v60, 0.0 }
 0x354   :  { %v1405_v61 = vsel %vm1390_vm13, %v1401_v54, 0.0  ;;  %v1406_v49 = vsel %vm1391_vm5, %v1402_v55, 0.0  ;;  %v1241_v19 = vsel %vm1240_vm1, 1, %v1844_v9  ;;  %vm2388_vm13 = vcmp.eq.s32.totalorder %v1423_v7, 1 }
 0x355   :  { %v1409_v1 = vrot.slane %v1405_v61, 4  ;;  %v1410_v2 = vrot.slane %v1406_v49, 4  ;;  %v2368_v58 = vpop.permute.xlu1 %1297  ;;  %vm1278_vm5 = vcmp.ne.f32.partialorder %v1277_v12, 0.0  ;;  %v1245_v31 = vrot.slane %v1241_v19, %v1904_v17 }
 0x356   :  { %v1436_v6 = vpop.permute.xlu0 %1435  ;;  %v1279_v34 = vsel %vm1278_vm5, 1, %v1844_v9  ;;  %v933_v49 = vrot.slane %v2298_v35, %v1904_v17 }
 0x357   :  { %1413 = vst [vmem:[#allocation4 + $0x10] sm:$0xf0] %v1409_v1  ;;  %1414 = vst [vmem:[#allocation4 + $0x20] sm:$0xf0] %v1410_v2  ;;  %v1440_v8 = vsel %vm304_vm8, %v1436_v6, %v1438_v5  ;;  %v1283_v42 = vrot.slane %v1279_v34, %v1904_v17  ;;  %v1287_v45 = vrot.slane %v1279_v34, %v1909_v20  ;;  %v1772_v34 = vld [vmem:[#allocation8] sm:$0xf] }
 0x358   :  { %v1444_v13 = vsel %vm2361_vm9, %v1440_v8, 0.0  ;;  %v1537_v14 = vld [vmem:[#allocation4 + $0x88] sm:$0xf]  ;;  %vm938_vm1 = vcmp.eq.s32.totalorder %v933_v49, 1 }
 0x359   :  { %1446 = vst [vmem:[#allocation4 + $0x18] sm:$0xf] %v1444_v13  ;;  %1746 = vmatprep.subr.msk.mxu1 %vm734_vm10, %v1537_v14  ;;  %v1504_v47 = vpop.permute.xlu1 %1503  ;;  %vm1289_vm9 = vcmp.eq.s32.totalorder %v1287_v45, 1 }
 0x35a   :  { %v1509_v22 = vsel %vm378_vm14, %v1504_v47, %v1506_v44  ;;  %v1328_v0 = vpop.permute.xlu0 %1327  ;;  %vm1358_vm14 = vcmp.eq.s32.totalorder %v1353_v29, 1 }
 0x35b   :  { %v1513_v5 = vsel %vm1498_vm15, %v1509_v22, 0.0  ;;  %v1331_v24 = vsel %vm190_vm11, %v2326_v21, %v1328_v0  ;;  %v1332_v11 = vsel %vm190_vm11, %v1328_v0, %v2338_v27  ;;  %v1249_v27 = vrot.slane %v1241_v19, %v1909_v20  ;;  %v1770_v22 = vld [vmem:[#allocation8] sm:$0xf0] }
 0x35c   :  { %1515 = vst [vmem:[#allocation4 + $0x98] sm:$0xf] %v1513_v5  ;;  %v1335_v26 = vsel %vm2378_vm0, %v1331_v24, 0.0  ;;  %v1336_v28 = vsel %vm2382_vm3, %v1332_v11, 0.0  ;;  %vm2416_vm11 = vcmp.eq.s32.totalorder %v1245_v31, 1  ;;  %v1707_v0 = vrot.slane %v1770_v22, 4 }
 0x35d   :  { %v1339_v32 = vrot.slane %v1335_v26, 4  ;;  %v1340_v21 = vrot.slane %v1336_v28, 4  ;;  %v1434_v33 = vpop.permute.xlu1 %1433  ;;  %v1771_v11 = vld [vmem:[#allocation8 + $0x8] sm:$0xf0] }
 0x35e   :  { %v1439_v36 = vsel %vm304_vm8, %v1434_v33, %v1436_v6  ;;  %v1366_v37 = vpop.permute.xlu0 %1365  ;;  %vm2420_vm8 = vcmp.eq.s32.totalorder %v1249_v27, 1  ;;  %v1708_v15 = vrot.slane %v1771_v11, 4 }
 0x35f   :  { %1343 = vst [vmem:[#allocation4 + $0x70] sm:$0xf0] %v1339_v32  ;;  %1344 = vst [vmem:[#allocation4 + $0x58] sm:$0xf0] %v1340_v21  ;;  %v1443_v38 = vsel %vm2388_vm13, %v1439_v36, 0.0  ;;  %v1370_v39 = vsel %vm230_vm2, %v1366_v37, %v2348_v41 }
 0x360   :  { %1445 = vst [vmem:[#allocation4 + $0x30] sm:$0xf] %v1443_v38  ;;  %v1374_v40 = vsel %vm2396_vm6, %v1370_v39, 0.0  ;;  %v1533_v20 = vld [vmem:[#allocation4 + $0x18] sm:$0xff]  ;;  %v1773_v39 = vld [vmem:[#allocation8 + $0x8] sm:$0xf] }
 0x361   :  { %1376 = vst [vmem:[#allocation4 + $0x20] sm:$0xf] %v1374_v40  ;;  %v1364_v9 = vpop.permute.xlu1 %1363 }
 0x362   :  { %v1369_v41 = vsel %vm230_vm2, %v1364_v9, %v1366_v37  ;;  %v1258_v46 = vpop.permute.xlu0 %1257  ;;  %vm2435_vm2 = vcmp.eq.s32.totalorder %v1283_v42, 1 }
 0x363   :  { %v1373_v50 = vsel %vm1358_vm14, %v1369_v41, 0.0  ;;  %v1261_v51 = vsel %vm116_vm12, %v2334_v25, %v1258_v46  ;;  %v1262_v57 = vsel %vm116_vm12, %v1258_v46, %v2356_v52  ;;  %v1536_v53 = vld [vmem:[#allocation4 + $0x98] sm:$0xf]  ;;  %v971_v25 = vrot.slane %v2309_v48, %v1904_v17 }
 0x364   :  { %1375 = vst [vmem:[#allocation4 + $0x10] sm:$0xf] %v1373_v50  ;;  %v1265_v54 = vsel %vm2416_vm11, %v1261_v51, 0.0  ;;  %v1266_v55 = vsel %vm2420_vm8, %v1262_v57, 0.0  ;;  %1747 = vmatpush1.msk.msra.mxu1 %vm734_vm10, %v1536_v53 }
 0x365   :  { %v1269_v60 = vrot.slane %v1265_v54, 4  ;;  %v1270_v52 = vrot.slane %v1266_v55, 4  ;;  %1654 = vmatprep.subr.mxu1 %v1533_v20  ;;  %v1294_v61 = vpop.permute.xlu1 %1293  ;;  %vm976_vm10 = vcmp.eq.s32.totalorder %v971_v25, 1 }
 0x366   :  { %v1296_v30 = vpop.permute.xlu0 %1295 }
 0x367   :  { %1273 = vst [vmem:[#allocation4 + $0x80] sm:$0xf0] %v1269_v60  ;;  %1274 = vst [vmem:[#allocation4 + $0x8] sm:$0xf0] %v1270_v52  ;;  %v1299_v62 = vsel %vm156_vm7, %v1294_v61, %v1296_v30  ;;  %v1300_v1 = vsel %vm156_vm7, %v1296_v30, %v2368_v58  ;;  %v1532_v2 = vld [vmem:[#allocation4 + $0x30] sm:$0xff] }
 0x368   :  { %v1303_v48 = vsel %vm2435_vm2, %v1299_v62, 0.0  ;;  %v1304_v3 = vsel %vm1289_vm9, %v1300_v1, 0.0  ;;  %1655 = vmatpush1.msra.mxu1 %v1532_v2  ;;  %v1529_v4 = vld [vmem:[#allocation4 + $0x20] sm:$0xff] }
 0x369   :  { %1305 = vst [vmem:[#allocation4 + $0x70] sm:$0xf] %v1303_v48  ;;  %1306 = vst [vmem:[#allocation4 + $0x58] sm:$0xf] %v1304_v3  ;;  %1656 = vmatprep.subr.mxu1 %v1529_v4  ;;  %v982_v17 = vpop.permute.xlu1 %981 }
 0x36a   :  { %v987_v35 = vsel %vm156_vm7, %v982_v17, %v2321_v63  ;;  %v944_v6 = vpop.permute.xlu0 %943  ;;  %v1517_v63 = vld [vmem:[%s2464_s4] sm:$0xf]  ;;  %s1855_s4 = smov [#allocation10]  }
 0x36b   :  { %v991_v7 = vsel %vm976_vm10, %v987_v35, 0.0  ;;  %v949_v58 = vsel %vm116_vm12, %v944_v6, %v2316_v56  ;;  %v1528_v8 = vld [vmem:[#allocation4 + $0x10] sm:$0xff]  ;;  %v1519_v56 = vld [vmem:[#allocation4 + $0x68] sm:$0xff]  ;;  %s1727_s21 = sshll.u32 %s1855_s4, 4  ;;  %s1728_s21 = int_to_ptr.vmem [resolvable:$true] %s1727_s21 }
 0x36c   :  { %993 = vst [vmem:[#allocation4 + $0x38] sm:$0xf] %v991_v7  ;;  %v953_v10 = vsel %vm938_vm1, %v949_v58, 0.0  ;;  %1657 = vmatpush1.msra.mxu1 %v1528_v8  ;;  %s1814_s22 = scalar_lea.vmem %s1728_s21, 256  ;;  %p1819_p11 = scmp.lt.s32.totalorder %s1728_s21, %s1728_s21 }
 0x36d   :  { %v957_v12 = vrot.slane %v953_v10, 4  ;;  %p1815_p10 = scmp.ne.s32.totalorder %s1728_s21, %s1814_s22  ;;  %p1820_p12 = scmp.lt.s32.totalorder %s1814_s22, %s1814_s22 }
 0x36e   :  { %v1521_v47 = vld [vmem:[#allocation4 + $0x8] sm:$0xff]  ;;  %v1520_v18 = vld [vmem:[#allocation4 + $0x80] sm:$0xff] }
 0x36f   :  { %961 = vst [vmem:[#allocation4 + $0x48] sm:$0xf0] %v957_v12  ;;  %p1821_p13 = por %p1820_p12, %p1819_p11 }
 0x370   :  { %v1525_v13 = vld [vmem:[#allocation4 + $0x58] sm:$0xff]  ;;  %v1524_v14 = vld [vmem:[#allocation4 + $0x70] sm:$0xff] }
 0x371   :  { %1658 = vmatprep.subr.mxu1 %v1525_v13  ;;  %p1822_p0 = pnand %p1821_p13, %p1815_p10 }
 0x372   :  { %1659 = vmatpush1.msra.mxu1 %v1524_v14 }
 0x373   :  { %1660 = vmatprep.subr.mxu1 %v1521_v47  ;;  %v1522_v16 = vld [vmem:[#allocation4 + $0x38] sm:$0xff] }
 0x374   :  { %1588 = vmatpush1.msra.mxu0 %v1522_v16  ;;  %1661 = vmatpush1.msra.mxu1 %v1520_v18 }
 0x375   :  { %1589 = vmatprep.subr.mxu0 %v1519_v56  ;;  %1748 = vmatmul.mubr.msk.f32.vlgmr.msra.gmra.mxu1 %vm730_vm4, %v1517_v63 }
 0x376   :  { %v1518_v19 = vld [vmem:[#allocation4 + $0x48] sm:$0xff] }
 0x377   :  { %1590 = vmatpush1.msra.mxu0 %v1518_v19  ;;  %v1542_v23 = vpop.permute.xlu0 %1541 }
 0x378   :  { %1745 = vmatmul.mubr.msk.f32.vlgmr.msra.gmra.mxu0 %vm730_vm4, %v1517_v63 }
 0x435   :  { %v1696_v5 = vpop.f32.mrf.mxu1 }
 0x436   :  { %v1697_v24 = vadd.f32 %v1696_v5, %v1542_v23 }
 0x437   :  { %v1698_v26 = vpop.f32.mrf.mxu1 }
 0x438   :  { %v1711_v28 = vadd.f32 %v1707_v0, %v1697_v24  ;;  %v1699_v29 = vadd.f32 %v1698_v26, %v1542_v23  ;;  %v1625_v31 = vpop.f32.mrf.mxu0 }
 0x439   :  { %v1626_v32 = vadd.f32 %v1625_v31, %v1542_v23 }
 0x43a   :  { %v1715_v21 = vrot.slane %v1711_v28, 4  ;;  %v1712_v33 = vadd.f32 %v1708_v15, %v1699_v29  ;;  %v1627_v27 = vpop.f32.mrf.mxu0 }
 0x43b   :  { %v1701_v36 = vadd.f32 %v1772_v34, %v1626_v32  ;;  %v1628_v37 = vadd.f32 %v1627_v27, %v1542_v23 }
 0x43c   :  { %1719 = vst [vmem:[#allocation10] sm:$0xf0] %v1715_v21  ;;  %v1716_v38 = vrot.slane %v1712_v33, 4 }
 0x43d   :  { %1703 = vst [vmem:[#allocation10] sm:$0xf] %v1701_v36  ;;  %v1702_v40 = vadd.f32 %v1773_v39, %v1628_v37 }
 0x43e   :  { %1720 = vst [vmem:[#allocation10 + $0x8] sm:$0xf0] %v1716_v38 }
 0x43f   :  { %1704 = vst [vmem:[#allocation10 + $0x8] sm:$0xf] %v1702_v40 }
 0x440   :  { %1825 = shalt.err (!%p1822_p0)
}
 0x441   :  { %1730 = dma.vmem_to_hbm [thread:$0]  %s1728_s21, 256, %s2466_s6, [#allocation7]  }
 0x442   :  { %1838 = dma.done.wait [#allocation7], 256  }
 0x443   :  { %1839 = vsyncadd [#allocation7], 4294967040 }
 0x444   :  { %1734 = vsyncpa [#allocation6], 1 }
 0x445   :  { %1735 = vsyncpa [#allocation9], 1 }
 0x446   :  { %1736 = vsyncpa [#allocation7], 1 }

</bundles_post_ra>
